<compile_context>
chip_gen: v5e
topology: v5e:2x2
jax: 0.10.0
libtpu: 0.0.40
codegen_flags: <defaults>
</compile_context>

<pallas_src>
import jax
import jax.numpy as jnp
import numpy as np
from jax.experimental import pallas as pl
from jax.experimental.pallas import tpu as pltpu

# ---------------- model config (small synthetic sizes) ----------------
NUM_USERS = 10
NUM_ITEMS = 12
GMF_DIM = 16          # gmf_out_dim (== GMF embedding dim)
MLP_EMBED = 16        # per-side MLP embedding dim
MLP_H1 = 32           # first MLP hidden layer width (in = 2*MLP_EMBED)
MLP_OUT = 16          # mlp_out_dim (last MLP hidden layer width)
FUSED_IN = GMF_DIM + MLP_OUT          # 32
FUSED_HID = FUSED_IN // 2             # 16  (output of self.hidden, returned)

PACK_W = 32                           # lane width of every packed operand
NVOC = NUM_USERS + NUM_ITEMS          # combined vocab (users then items)
SLAB_ROWS = 5 * PACK_W                # 5 padded (32,32) weight blocks = 160 rows
BIAS_ROWS = 8                         # bias pack rows (sublane-tile aligned)
OUT_W = PACK_W                        # output slab: cols 0:16 fused, col 16 score

BATCH = 512
TB = 256              # batch tile (>=256 per review; grid has 2 parallel steps)

# layout assumptions of the packing scheme
assert GMF_DIM == MLP_EMBED
assert GMF_DIM + MLP_EMBED == PACK_W == MLP_H1
assert MLP_OUT <= PACK_W and FUSED_HID < PACK_W


def neumf_kernel(uidx_ref, iidx_ref, tbl_ref, w_ref, bias_ref, out_ref):
    f32 = jnp.float32
    bf16 = jnp.bfloat16
    tb = uidx_ref.shape[0]

    # --- in-kernel embedding gather via one-hot MXU matmul (tables are VMEM resident)
    vocab = jax.lax.broadcasted_iota(jnp.int32, (tb, NVOC), 1)
    uoh = jnp.where(uidx_ref[...] == vocab, 1.0, 0.0).astype(bf16)              # (TB, NVOC)
    ioh = jnp.where((iidx_ref[...] + NUM_USERS) == vocab, 1.0, 0.0).astype(bf16)
    tbl = tbl_ref[...]                                                           # (NVOC, 32) bf16
    u_emb = jnp.dot(uoh, tbl, preferred_element_type=f32)    # [gmf_u | mlp_u]   (TB, 32)
    i_emb = jnp.dot(ioh, tbl, preferred_element_type=f32)    # [gmf_i | mlp_i]   (TB, 32)

    # --- packed parameters (static, tile-aligned views) ---
    w1u = w_ref[0:32, :]        # rows 16:32 = mlp W1 (user half), rows 0:16 zero
    w1i = w_ref[32:64, :]       # rows 16:32 = mlp W1 (item half), rows 0:16 zero
    w2 = w_ref[64:96, :]        # cols 0:16 = mlp W2, cols 16:32 zero
    hwg = w_ref[96:128, :]      # rows/cols 0:16 = hidden W (GMF half), rest zero
    hwm = w_ref[128:160, :]     # rows/cols 0:16 = hidden W (MLP half), rest zero
    bias = bias_ref[...]        # (8, 32) f32
    b1 = bias[0:1, :]
    b2 = bias[1:2, :]           # cols 16:32 zero
    hb = bias[2:3, :]           # cols 16:32 zero
    nw = bias[3:4, :]           # nmf weight as a row, cols 16:32 zero
    nb = bias[4:5, 0:1]         # nmf bias scalar

    # --- GMF branch: elementwise product (junk in cols 16:32 is killed by hwg zeros)
    gmf = 0.5 * (u_emb * i_emb)                                                  # (TB, 32)

    # --- MLP branch: cat([u, i]) @ W1 realized as two padded matmuls ---
    h1 = (jnp.dot(u_emb.astype(bf16), w1u, preferred_element_type=f32)
          + jnp.dot(i_emb.astype(bf16), w1i, preferred_element_type=f32)
          + b1)
    h1 = jnp.maximum(h1, 0.0)                                                    # (TB, 32)
    h2 = jnp.maximum(jnp.dot(h1.astype(bf16), w2, preferred_element_type=f32) + b2, 0.0)
    mlp = 0.5 * h2                                                               # cols 16:32 = 0

    # --- fusion head: cat([gmf_out, mlp_out]) @ HW + hb (split padded matmuls) ---
    fused = (jnp.dot(gmf.astype(bf16), hwg, preferred_element_type=f32)
             + jnp.dot(mlp.astype(bf16), hwm, preferred_element_type=f32)
             + hb)                                                               # cols 16:32 = 0

    # TODO(synk): nn.Dropout(0.7) is identity in eval/inference mode; training-mode
    # dropout (pltpu.prng_* + mask + 1/(1-p) scaling) is intentionally not emulated.

    # --- final Linear(FUSED_HID, 1) as a VPU reduction (avoids an N=1 MXU matmul) ---
    score = jnp.sum(fused * nw, axis=-1, keepdims=True) + nb                     # (TB, 1)

    # pack score into the fused slab: cols 0:16 = fused, col 16 = score (single store)
    col = jax.lax.broadcasted_iota(jnp.int32, (tb, OUT_W), 1)
    out_ref[...] = jnp.where(col == FUSED_HID, score, fused)


def pack_params(p):
    """Pack natural params into 3 lane-dense operands: emb table, weight slab, bias pack."""
    f32, bf16 = jnp.float32, jnp.bfloat16

    # combined embedding table: rows 0:NU users, NU:NU+NI items; cols 0:16 GMF, 16:32 MLP
    emb_tbl = jnp.concatenate([
        jnp.concatenate([p["gmf_user_embed"], p["mlp_user_embed"]], axis=1),
        jnp.concatenate([p["gmf_item_embed"], p["mlp_item_embed"]], axis=1),
    ], axis=0).astype(bf16)                                          # (NVOC, 32)

    def pad(w, r0=0, c0=0):
        out = jnp.zeros((PACK_W, PACK_W), f32)
        return out.at[r0:r0 + w.shape[0], c0:c0 + w.shape[1]].set(w)

    w_slab = jnp.concatenate([
        pad(p["mlp_w1_u"], r0=GMF_DIM),       # acts on the MLP half of u_emb
        pad(p["mlp_w1_i"], r0=GMF_DIM),       # acts on the MLP half of i_emb
        pad(p["mlp_w2"]),                     # output in cols 0:16
        pad(p["hidden_w_gmf"]),               # acts on cols 0:16 of gmf product
        pad(p["hidden_w_mlp"]),               # acts on cols 0:16 of mlp_out
    ], axis=0).astype(bf16)                                          # (160, 32)

    bias = jnp.zeros((BIAS_ROWS, PACK_W), f32)
    bias = bias.at[0, :MLP_H1].set(p["mlp_b1"])
    bias = bias.at[1, :MLP_OUT].set(p["mlp_b2"])
    bias = bias.at[2, :FUSED_HID].set(p["hidden_b"])
    bias = bias.at[3, :FUSED_HID].set(p["nmf_w"].reshape(-1))
    bias = bias.at[4, 0].set(p["nmf_b"].reshape(())) 
    return emb_tbl, w_slab, bias


def neumf_forward(user, item, params):
    emb_tbl, w_slab, bias_pack = pack_params(params)

    B = user.shape[0]
    assert B % TB == 0
    grid = (B // TB,)
    user2 = user.astype(jnp.int32).reshape(B, 1)
    item2 = item.astype(jnp.int32).reshape(B, 1)

    def batch_spec(d):
        return pl.BlockSpec((TB, d), lambda i: (i, 0))

    def full_spec(shape):
        return pl.BlockSpec(shape, lambda i: (0, 0))

    in_specs = [
        batch_spec(1),                         # user indices
        batch_spec(1),                         # item indices
        full_spec((NVOC, PACK_W)),             # embedding table (bf16)
        full_spec((SLAB_ROWS, PACK_W)),        # weight slab (bf16)
        full_spec((BIAS_ROWS, PACK_W)),        # bias pack (f32)
    ]
    out_specs = batch_spec(OUT_W)
    out_shape = jax.ShapeDtypeStruct((B, OUT_W), jnp.float32)

    f = pl.pallas_call(
        neumf_kernel,
        out_shape=out_shape,
        grid_spec=pltpu.PrefetchScalarGridSpec(
            num_scalar_prefetch=0,
            grid=grid,
            in_specs=in_specs,
            out_specs=out_specs,
        ),
        compiler_params=pltpu.CompilerParams(
            dimension_semantics=("parallel",)),
    )
    out = f(user2, item2, emb_tbl, w_slab, bias_pack)
    fused = out[:, :FUSED_HID]
    score = out[:, FUSED_HID:FUSED_HID + 1]
    return score, fused


def neumf_reference(user, item, params):
    """Pure-JAX reference mirroring the kernel's bf16-storage / f32-accumulate numerics."""
    f32, bf16 = jnp.float32, jnp.bfloat16
    r = lambda x: x.astype(bf16).astype(f32)                       # bf16 storage rounding

    def bdot(a, b):                                                # bf16-input dot, f32 accum
        return jnp.dot(a.astype(bf16), b.astype(bf16), preferred_element_type=f32)

    gmf_u = r(params["gmf_user_embed"])[user]
    gmf_i = r(params["gmf_item_embed"])[item]
    mlp_u = r(params["mlp_user_embed"])[user]
    mlp_i = r(params["mlp_item_embed"])[item]

    gmf_out = 0.5 * (gmf_u * gmf_i)

    x = jnp.concatenate([mlp_u, mlp_i], axis=1)
    w1 = jnp.concatenate([params["mlp_w1_u"], params["mlp_w1_i"]], axis=0)
    h1 = jnp.maximum(bdot(x, w1) + params["mlp_b1"][None, :], 0.0)
    h2 = jnp.maximum(bdot(h1, params["mlp_w2"]) + params["mlp_b2"][None, :], 0.0)
    mlp_out = 0.5 * h2

    fused_in = jnp.concatenate([gmf_out, mlp_out], axis=1)
    hw = jnp.concatenate([params["hidden_w_gmf"], params["hidden_w_mlp"]], axis=0)
    fused = bdot(fused_in, hw) + params["hidden_b"][None, :]

    score = (jnp.sum(fused * params["nmf_w"].reshape(-1)[None, :], axis=-1, keepdims=True)
             + params["nmf_b"][None, :])
    return score, fused


def init_params(key):
    """Deterministic synthetic parameters (shapes from the module __init__)."""
    ks = jax.random.split(key, 12)

    def unif(k, shape, bound):
        return jax.random.uniform(k, shape, jnp.float32, -bound, bound)

    nmf_bound = 1.0 / np.sqrt(FUSED_IN)
    return {
        # embeddings
        "gmf_user_embed": 0.1 * jax.random.normal(ks[0], (NUM_USERS, GMF_DIM), jnp.float32),
        "gmf_item_embed": 0.1 * jax.random.normal(ks[1], (NUM_ITEMS, GMF_DIM), jnp.float32),
        "mlp_user_embed": 0.1 * jax.random.normal(ks[2], (NUM_USERS, MLP_EMBED), jnp.float32),
        "mlp_item_embed": 0.1 * jax.random.normal(ks[3], (NUM_ITEMS, MLP_EMBED), jnp.float32),
        # MLP hidden layers (weights stored (in, out); layer-1 split over the concat axis)
        "mlp_w1_u": unif(ks[4], (MLP_EMBED, MLP_H1), 1.0 / np.sqrt(2 * MLP_EMBED)),
        "mlp_w1_i": unif(ks[5], (MLP_EMBED, MLP_H1), 1.0 / np.sqrt(2 * MLP_EMBED)),
        "mlp_b1":   jnp.zeros((MLP_H1,), jnp.float32),
        "mlp_w2":   unif(ks[6], (MLP_H1, MLP_OUT), 1.0 / np.sqrt(MLP_H1)),
        "mlp_b2":   jnp.zeros((MLP_OUT,), jnp.float32),
        # self.hidden: Linear(FUSED_IN, FUSED_HID), split over the concat axis
        "hidden_w_gmf": unif(ks[7], (GMF_DIM, FUSED_HID), 1.0 / np.sqrt(FUSED_IN)),
        "hidden_w_mlp": unif(ks[8], (MLP_OUT, FUSED_HID), 1.0 / np.sqrt(FUSED_IN)),
        "hidden_b":     unif(ks[9], (FUSED_HID,), 1.0 / np.sqrt(FUSED_IN)),
        # self.nmf: Linear(FUSED_HID, 1), uniform(-bound, bound) weight, zero bias
        "nmf_w": unif(ks[10], (FUSED_HID, 1), nmf_bound),
        "nmf_b": jnp.zeros((1,), jnp.float32),
    }


if __name__ == "__main__":
    key = jax.random.PRNGKey(0)
    pkey, ukey, ikey = jax.random.split(key, 3)
    params = init_params(pkey)

    user = jax.random.randint(ukey, (BATCH,), 0, NUM_USERS, dtype=jnp.int32)
    item = jax.random.randint(ikey, (BATCH,), 0, NUM_ITEMS, dtype=jnp.int32)

    score, fused = neumf_forward(user, item, params)
    jax.block_until_ready((score, fused))
    score_ref, fused_ref = neumf_reference(user, item, params)

    assert score.shape == (BATCH, 1) and fused.shape == (BATCH, FUSED_HID)
    np.testing.assert_allclose(np.asarray(score), np.asarray(score_ref), rtol=1e-4, atol=1e-5)
    np.testing.assert_allclose(np.asarray(fused), np.asarray(fused_ref), rtol=1e-4, atol=1e-5)

    print("KERNEL_OK")
</pallas_src>

<mosaic_0001>
module attributes {stable_mosaic.version = 11 : i64} {
  func.func @neumf_kernel(%arg0: i32, %arg1: memref<256x1xi32, #tpu.memory_space<vmem>>, %arg2: memref<256x1xi32, #tpu.memory_space<vmem>>, %arg3: memref<22x32xbf16, #tpu.memory_space<vmem>>, %arg4: memref<160x32xbf16, #tpu.memory_space<vmem>>, %arg5: memref<8x32xf32, #tpu.memory_space<vmem>>, %arg6: memref<256x32xf32, #tpu.memory_space<vmem>>) attributes {dimension_semantics = [#tpu.dimension_semantics<parallel>], iteration_bounds = array<i64: 2>, scalar_prefetch = 0 : i64, scratch_operands = 0 : i64, tpu.core_type = #tpu.core_type<tc>, window_params = [{transform_indices = @transform_0, window_bounds = array<i64: 256, 1>}, {transform_indices = @transform_1, window_bounds = array<i64: 256, 1>}, {pipeline_mode = #tpu.pipeline_mode<synchronous>, transform_indices = @transform_2, window_bounds = array<i64: 22, 32>}, {pipeline_mode = #tpu.pipeline_mode<synchronous>, transform_indices = @transform_3, window_bounds = array<i64: 160, 32>}, {pipeline_mode = #tpu.pipeline_mode<synchronous>, transform_indices = @transform_4, window_bounds = array<i64: 8, 32>}, {transform_indices = @transform_5, window_bounds = array<i64: 256, 32>}]} {
    %0 = tpu.iota {dimensions = array<i32: 1>} : vector<256x22xi32>
    %c0 = arith.constant 0 : index
    %c0_0 = arith.constant 0 : index
    %1 = vector.load %arg1[%c0, %c0_0] : memref<256x1xi32, #tpu.memory_space<vmem>>, vector<256x1xi32>
    %2 = vector.broadcast %1 : vector<256x1xi32> to vector<256x22xi32>
    %3 = arith.cmpi eq, %2, %0 : vector<256x22xi32>
    %cst = arith.constant 1.000000e+00 : f32
    %cst_1 = arith.constant 0.000000e+00 : f32
    %4 = vector.broadcast %cst : f32 to vector<256x22xf32>
    %5 = vector.broadcast %cst_1 : f32 to vector<256x22xf32>
    %6 = arith.select %3, %4, %5 : vector<256x22xi1>, vector<256x22xf32>
    %7 = arith.truncf %6 : vector<256x22xf32> to vector<256x22xbf16>
    %c0_2 = arith.constant 0 : index
    %c0_3 = arith.constant 0 : index
    %8 = vector.load %arg2[%c0_2, %c0_3] : memref<256x1xi32, #tpu.memory_space<vmem>>, vector<256x1xi32>
    %c10_i32 = arith.constant 10 : i32
    %9 = vector.broadcast %c10_i32 : i32 to vector<256x1xi32>
    %10 = arith.addi %8, %9 : vector<256x1xi32>
    %11 = vector.broadcast %10 : vector<256x1xi32> to vector<256x22xi32>
    %12 = arith.cmpi eq, %11, %0 : vector<256x22xi32>
    %cst_4 = arith.constant 1.000000e+00 : f32
    %cst_5 = arith.constant 0.000000e+00 : f32
    %13 = vector.broadcast %cst_4 : f32 to vector<256x22xf32>
    %14 = vector.broadcast %cst_5 : f32 to vector<256x22xf32>
    %15 = arith.select %12, %13, %14 : vector<256x22xi1>, vector<256x22xf32>
    %16 = arith.truncf %15 : vector<256x22xf32> to vector<256x22xbf16>
    %c0_6 = arith.constant 0 : index
    %c0_7 = arith.constant 0 : index
    %17 = vector.load %arg3[%c0_6, %c0_7] : memref<22x32xbf16, #tpu.memory_space<vmem>>, vector<22x32xbf16>
    %cst_8 = arith.constant dense<0.000000e+00> : vector<256x32xf32>
    %18 = tpu.matmul %7, %17, %cst_8 {dimension_numbers = #tpu.dot_dimension_numbers<[1], [0], [0], [1], [0, 0, 1, 1], [], []>} : vector<256x22xbf16>, vector<22x32xbf16>, vector<256x32xf32> -> vector<256x32xf32>
    %cst_9 = arith.constant dense<0.000000e+00> : vector<256x32xf32>
    %19 = tpu.matmul %16, %17, %cst_9 {dimension_numbers = #tpu.dot_dimension_numbers<[1], [0], [0], [1], [0, 0, 1, 1], [], []>} : vector<256x22xbf16>, vector<22x32xbf16>, vector<256x32xf32> -> vector<256x32xf32>
    %c0_10 = arith.constant 0 : index
    %c0_11 = arith.constant 0 : index
    %20 = vector.load %arg4[%c0_10, %c0_11] : memref<160x32xbf16, #tpu.memory_space<vmem>>, vector<32x32xbf16>
    %c32 = arith.constant 32 : index
    %c0_12 = arith.constant 0 : index
    %21 = vector.load %arg4[%c32, %c0_12] : memref<160x32xbf16, #tpu.memory_space<vmem>>, vector<32x32xbf16>
    %c64 = arith.constant 64 : index
    %c0_13 = arith.constant 0 : index
    %22 = vector.load %arg4[%c64, %c0_13] : memref<160x32xbf16, #tpu.memory_space<vmem>>, vector<32x32xbf16>
    %c96 = arith.constant 96 : index
    %c0_14 = arith.constant 0 : index
    %23 = vector.load %arg4[%c96, %c0_14] : memref<160x32xbf16, #tpu.memory_space<vmem>>, vector<32x32xbf16>
    %c128 = arith.constant 128 : index
    %c0_15 = arith.constant 0 : index
    %24 = vector.load %arg4[%c128, %c0_15] : memref<160x32xbf16, #tpu.memory_space<vmem>>, vector<32x32xbf16>
    %c0_16 = arith.constant 0 : index
    %c0_17 = arith.constant 0 : index
    %25 = vector.load %arg5[%c0_16, %c0_17] : memref<8x32xf32, #tpu.memory_space<vmem>>, vector<8x32xf32>
    %26 = vector.extract_strided_slice %25 {offsets = [0, 0], sizes = [1, 32], strides = [1, 1]} : vector<8x32xf32> to vector<1x32xf32>
    %27 = vector.extract_strided_slice %25 {offsets = [1, 0], sizes = [1, 32], strides = [1, 1]} : vector<8x32xf32> to vector<1x32xf32>
    %28 = vector.extract_strided_slice %25 {offsets = [2, 0], sizes = [1, 32], strides = [1, 1]} : vector<8x32xf32> to vector<1x32xf32>
    %29 = vector.extract_strided_slice %25 {offsets = [3, 0], sizes = [1, 32], strides = [1, 1]} : vector<8x32xf32> to vector<1x32xf32>
    %30 = vector.extract_strided_slice %25 {offsets = [4, 0], sizes = [1, 1], strides = [1, 1]} : vector<8x32xf32> to vector<1x1xf32>
    %31 = arith.mulf %18, %19 : vector<256x32xf32>
    %cst_18 = arith.constant 5.000000e-01 : f32
    %32 = vector.broadcast %cst_18 : f32 to vector<256x32xf32>
    %33 = arith.mulf %32, %31 : vector<256x32xf32>
    %34 = arith.truncf %18 : vector<256x32xf32> to vector<256x32xbf16>
    %cst_19 = arith.constant dense<0.000000e+00> : vector<256x32xf32>
    %35 = tpu.matmul %34, %20, %cst_19 {dimension_numbers = #tpu.dot_dimension_numbers<[1], [0], [0], [1], [0, 0, 1, 1], [], []>} : vector<256x32xbf16>, vector<32x32xbf16>, vector<256x32xf32> -> vector<256x32xf32>
    %36 = arith.truncf %19 : vector<256x32xf32> to vector<256x32xbf16>
    %cst_20 = arith.constant dense<0.000000e+00> : vector<256x32xf32>
    %37 = tpu.matmul %36, %21, %cst_20 {dimension_numbers = #tpu.dot_dimension_numbers<[1], [0], [0], [1], [0, 0, 1, 1], [], []>} : vector<256x32xbf16>, vector<32x32xbf16>, vector<256x32xf32> -> vector<256x32xf32>
    %38 = arith.addf %35, %37 : vector<256x32xf32>
    %39 = vector.broadcast %26 : vector<1x32xf32> to vector<256x32xf32>
    %40 = arith.addf %38, %39 : vector<256x32xf32>
    %cst_21 = arith.constant 0.000000e+00 : f32
    %41 = vector.broadcast %cst_21 : f32 to vector<256x32xf32>
    %42 = arith.maximumf %40, %41 : vector<256x32xf32>
    %43 = arith.truncf %42 : vector<256x32xf32> to vector<256x32xbf16>
    %cst_22 = arith.constant dense<0.000000e+00> : vector<256x32xf32>
    %44 = tpu.matmul %43, %22, %cst_22 {dimension_numbers = #tpu.dot_dimension_numbers<[1], [0], [0], [1], [0, 0, 1, 1], [], []>} : vector<256x32xbf16>, vector<32x32xbf16>, vector<256x32xf32> -> vector<256x32xf32>
    %45 = vector.broadcast %27 : vector<1x32xf32> to vector<256x32xf32>
    %46 = arith.addf %44, %45 : vector<256x32xf32>
    %cst_23 = arith.constant 0.000000e+00 : f32
    %47 = vector.broadcast %cst_23 : f32 to vector<256x32xf32>
    %48 = arith.maximumf %46, %47 : vector<256x32xf32>
    %cst_24 = arith.constant 5.000000e-01 : f32
    %49 = vector.broadcast %cst_24 : f32 to vector<256x32xf32>
    %50 = arith.mulf %49, %48 : vector<256x32xf32>
    %51 = arith.truncf %33 : vector<256x32xf32> to vector<256x32xbf16>
    %cst_25 = arith.constant dense<0.000000e+00> : vector<256x32xf32>
    %52 = tpu.matmul %51, %23, %cst_25 {dimension_numbers = #tpu.dot_dimension_numbers<[1], [0], [0], [1], [0, 0, 1, 1], [], []>} : vector<256x32xbf16>, vector<32x32xbf16>, vector<256x32xf32> -> vector<256x32xf32>
    %53 = arith.truncf %50 : vector<256x32xf32> to vector<256x32xbf16>
    %cst_26 = arith.constant dense<0.000000e+00> : vector<256x32xf32>
    %54 = tpu.matmul %53, %24, %cst_26 {dimension_numbers = #tpu.dot_dimension_numbers<[1], [0], [0], [1], [0, 0, 1, 1], [], []>} : vector<256x32xbf16>, vector<32x32xbf16>, vector<256x32xf32> -> vector<256x32xf32>
    %55 = arith.addf %52, %54 : vector<256x32xf32>
    %56 = vector.broadcast %28 : vector<1x32xf32> to vector<256x32xf32>
    %57 = arith.addf %55, %56 : vector<256x32xf32>
    %58 = vector.broadcast %29 : vector<1x32xf32> to vector<256x32xf32>
    %59 = arith.mulf %57, %58 : vector<256x32xf32>
    %cst_27 = arith.constant dense<0.000000e+00> : vector<256xf32>
    %60 = vector.multi_reduction <add>, %59, %cst_27 [1] : vector<256x32xf32> to vector<256xf32>
    %61 = vector.shape_cast %60 : vector<256xf32> to vector<256x1xf32>
    %62 = vector.broadcast %30 : vector<1x1xf32> to vector<256x1xf32>
    %63 = arith.addf %61, %62 : vector<256x1xf32>
    %64 = tpu.iota {dimensions = array<i32: 1>} : vector<256x32xi32>
    %c16_i32 = arith.constant 16 : i32
    %65 = vector.broadcast %c16_i32 : i32 to vector<256x32xi32>
    %66 = arith.cmpi eq, %64, %65 : vector<256x32xi32>
    %67 = vector.shape_cast %63 : vector<256x1xf32> to vector<256x1xf32>
    %68 = vector.broadcast %67 : vector<256x1xf32> to vector<256x32xf32>
    %69 = arith.select %66, %68, %57 : vector<256x32xi1>, vector<256x32xf32>
    %c0_28 = arith.constant 0 : index
    %c0_29 = arith.constant 0 : index
    %70 = vector.load %arg6[%c0_28, %c0_29] : memref<256x32xf32, #tpu.memory_space<vmem>>, vector<256x32xf32>
    tpu.vector_store %arg6[%c0_28, %c0_29], %69 {strides = array<i32>} : memref<256x32xf32, #tpu.memory_space<vmem>>, vector<256x32xf32>,
    return
  }
  func.func @transform_0(%arg0: i32) -> (i32, i32) {
    %c0_i32 = arith.constant 0 : i32
    %c0_i32_0 = arith.constant 0 : i32
    return %arg0, %c0_i32 : i32, i32
  }
  func.func @transform_1(%arg0: i32) -> (i32, i32) {
    %c0_i32 = arith.constant 0 : i32
    %c0_i32_0 = arith.constant 0 : i32
    return %arg0, %c0_i32 : i32, i32
  }
  func.func @transform_2(%arg0: i32) -> (i32, i32) {
    %c0_i32 = arith.constant 0 : i32
    %c0_i32_0 = arith.constant 0 : i32
    %c0_i32_1 = arith.constant 0 : i32
    return %c0_i32, %c0_i32_0 : i32, i32
  }
  func.func @transform_3(%arg0: i32) -> (i32, i32) {
    %c0_i32 = arith.constant 0 : i32
    %c0_i32_0 = arith.constant 0 : i32
    %c0_i32_1 = arith.constant 0 : i32
    return %c0_i32, %c0_i32_0 : i32, i32
  }
  func.func @transform_4(%arg0: i32) -> (i32, i32) {
    %c0_i32 = arith.constant 0 : i32
    %c0_i32_0 = arith.constant 0 : i32
    %c0_i32_1 = arith.constant 0 : i32
    return %c0_i32, %c0_i32_0 : i32, i32
  }
  func.func @transform_5(%arg0: i32) -> (i32, i32) {
    %c0_i32 = arith.constant 0 : i32
    %c0_i32_0 = arith.constant 0 : i32
    return %arg0, %c0_i32 : i32, i32
  }
}

</mosaic_0001>

<bundles_post_ra>
// kernel: tpu_custom_call.1
= control target key start
LH: loop header
LB: loop body
LE: loop exit
PB: predicated region body
PF: predicated region fallthrough
CT: control target
= control target key end

     0   :  { %s2761_s18 = smov 0   ;;  %s4040_s0 = inlined_call_operand.vmem [shape: s32[512,1], index: 0, kind: input, shape index: {}]   ;;  %s4041_s1 = inlined_call_operand.vmem [shape: s32[512,1], index: 1, kind: input, shape index: {}]   ;;  %s4042_s2 = inlined_call_operand.vmem [shape: bf16[22,32], index: 2, kind: input, shape index: {}]   ;;  %s4043_s3 = inlined_call_operand.vmem [shape: bf16[160,32], index: 3, kind: input, shape index: {}]   ;;  %s4044_s4 = inlined_call_operand.vmem [shape: f32[8,32], index: 4, kind: input, shape index: {}]   ;;  %s4045_s5 = inlined_call_operand.vmem [shape: f32[512,32], index: 5, kind: output, shape index: {}]  }
   0x1 LB: > { %s2521_s19 = sadd.s32 4294967295, %s2727_s18   ;;  %p2525_p0 = scmp.ge.s32.totalorder %s2727_s18, 1  ;;  %s2727_s18 = sphi %s2761_s18, %s15_s18  }
   0x2   : > { %p199_p1 = scmp.lt.s32.totalorder %s2727_s18, 3 }
   0x4   : > { %p200_p2 = pnand %p2525_p0, %p199_p1 }
   0x6   : > { %203 = sbr.rel (%p200_p2) target bundleno = 1514 (0x5ea), region = 40 }
   0xb   : > { %s2526_s20 = sshll.u32 %s2521_s19, 5  ;;  %v2729_v0 = vmov 0   ;;  %v703_v52 = vld [vmem:[%s4042_s2 + $0x8] sm:$0x7]  ;;  %vm762_vm0 = vcmask 1042432   ;;  %v2690_v60 = vld [vmem:[%s4042_s2] sm:$0xff] }
   0xc   : > { %2719 = vset.pattern.permute.xlu2 %v2729_v0  ;;  %2718 = vset.pattern.permute.xlu1 %v2729_v0  ;;  %p233_p3 = scmp.lt.s32.totalorder %s2526_s20, 63  ;;  %v709_v55 = vunpack.c.l.b16 %v703_v52  ;;  %vm713_vm3 = vcmask 179200  }
   0xd   : > { %2717 = vset.pattern.permute.xlu0 %v2729_v0 }
   0xe   : > { %s4083_s20 = smov (!%p233_p3, %s2526_s20), 63  ;;  %v711_v57 = vpack.c.b16 %v709_v55, %v709_v55 }
   0xf   : > { %s2769_s21 = sshll.u32 %s4083_s20, 3 }
  0x10   : > { %s2775_s24 = scalar_lea.vmem %s4040_s0, %s2769_s21  ;;  %s2787_s27 = scalar_lea.vmem %s4041_s1, %s2769_s21  ;;  %v764_v58 = vsel %vm762_vm0, %v711_v57, 0 }
  0x11   : > { %v281_v1 = vld [vmem:[%s2775_s24 + $0xe0] sm:$0xff]  ;;  %v279_v2 = vld [vmem:[%s2775_s24 + $0xd0] sm:$0xff]  ;;  %v282_v4 = vld [vmem:[%s2775_s24 + $0xe8] sm:$0xff]  ;;  %2701 = vmatpush.bf16.msra.mxu3 %v764_v58  ;;  %772 = vmatpush.bf16.msra.mxu0 %v764_v58  ;;  %s3755_s10 = scalar_lea.vmem %s4045_s5, %s2769_s21 }
  0x12   : > { %v277_v3 = vld [vmem:[%s2775_s24 + $0xc0] sm:$0xff]  ;;  %370 = vperm.xlu2 %2719, %v281_v1   ;;  %364 = vperm.xlu1 %2718, %v279_v2   ;;  %v280_v5 = vld [vmem:[%s2775_s24 + $0xd8] sm:$0xff]  ;;  %v278_v6 = vld [vmem:[%s2775_s24 + $0xc8] sm:$0xff] }
  0x13   : > { %358 = vperm.xlu0 %2717, %v277_v3   ;;  %v485_v7 = vld [vmem:[%s2787_s27 + $0xc0] sm:$0xff]  ;;  %v284_v9 = vld [vmem:[%s2775_s24 + $0xf8] sm:$0xff]  ;;  %v283_v10 = vld [vmem:[%s2775_s24 + $0xf0] sm:$0xff]  ;;  %909 = vmatpush.bf16.msra.mxu1 %v764_v58 }
  0x14   : > { %v517_v8 = vadd.s32 10, %v485_v7  ;;  %v488_v11 = vld [vmem:[%s2787_s27 + $0xd8] sm:$0xff]  ;;  %v487_v12 = vld [vmem:[%s2787_s27 + $0xd0] sm:$0xff]  ;;  %v486_v13 = vld [vmem:[%s2787_s27 + $0xc8] sm:$0xff] }
  0x15   : > { %v520_v14 = vadd.s32 10, %v488_v11  ;;  %v519_v15 = vadd.s32 10, %v487_v12  ;;  %v518_v16 = vadd.s32 10, %v486_v13  ;;  %v491_v17 = vld [vmem:[%s2787_s27 + $0xf0] sm:$0xff]  ;;  %v490_v18 = vld [vmem:[%s2787_s27 + $0xe8] sm:$0xff]  ;;  %v489_v19 = vld [vmem:[%s2787_s27 + $0xe0] sm:$0xff]  ;;  %2702 = vmatpush.bf16.msra.mxu3 %v2690_v60  ;;  %773 = vmatpush.bf16.msra.mxu0 %v2690_v60  ;;  %v251_v13 = vlaneseq }
  0x16   : > { %v523_v20 = vadd.s32 10, %v491_v17  ;;  %v522_v21 = vadd.s32 10, %v490_v18  ;;  %v521_v22 = vadd.s32 10, %v489_v19  ;;  %v492_v23 = vld [vmem:[%s2787_s27 + $0xf8] sm:$0xff]  ;;  %v254_v25 = vld [vmem:[%s2775_s24 + $0x8] sm:$0xff]  ;;  %v253_v26 = vld [vmem:[%s2775_s24] sm:$0xff] }
  0x17   : > { %v524_v24 = vadd.s32 10, %v492_v23  ;;  %v462_v27 = vld [vmem:[%s2787_s27 + $0x8] sm:$0xff]  ;;  %v461_v28 = vld [vmem:[%s2787_s27] sm:$0xff]  ;;  %v255_v31 = vld [vmem:[%s2775_s24 + $0x10] sm:$0xff]  ;;  %910 = vmatpush.bf16.msra.mxu1 %v2690_v60  ;;  %v2840_v18 = vand.u32 127, %v251_v13 }
  0x18   : > { %v494_v29 = vadd.s32 10, %v462_v27  ;;  %v493_v30 = vadd.s32 10, %v461_v28  ;;  %v464_v32 = vld [vmem:[%s2787_s27 + $0x18] sm:$0xff]  ;;  %v463_v33 = vld [vmem:[%s2787_s27 + $0x10] sm:$0xff]  ;;  %v465_v37 = vld [vmem:[%s2787_s27 + $0x20] sm:$0xff] }
  0x19   : > { %v496_v34 = vadd.s32 10, %v464_v32  ;;  %v495_v35 = vadd.s32 10, %v463_v33  ;;  %v256_v36 = vld [vmem:[%s2775_s24 + $0x18] sm:$0xff]  ;;  %v497_v38 = vadd.s32 10, %v465_v37  ;;  %v258_v39 = vld [vmem:[%s2775_s24 + $0x28] sm:$0xff]  ;;  %v257_v40 = vld [vmem:[%s2775_s24 + $0x20] sm:$0xff]  ;;  %2703 = vmatpush.bf16.msrb.mxu3 %v764_v58 }
  0x1a   : > { %373 = vperm.xlu2 %2719, %v282_v4   ;;  %367 = vperm.xlu1 %2718, %v280_v5   ;;  %v466_v41 = vld [vmem:[%s2787_s27 + $0x28] sm:$0xff]  ;;  %v260_v43 = vld [vmem:[%s2775_s24 + $0x38] sm:$0xff]  ;;  %v259_v44 = vld [vmem:[%s2775_s24 + $0x30] sm:$0xff]  ;;  %4052 = vst [vmem:[#allocation2_spill] sm:$0xff] %v2840_v18 }
  0x1b   : > { %361 = vperm.xlu0 %2717, %v278_v6   ;;  %v498_v42 = vadd.s32 10, %v466_v41  ;;  %v468_v45 = vld [vmem:[%s2787_s27 + $0x38] sm:$0xff]  ;;  %v467_v46 = vld [vmem:[%s2787_s27 + $0x30] sm:$0xff]  ;;  %v261_v49 = vld [vmem:[%s2775_s24 + $0x40] sm:$0xff] }
  0x1c   : > { %v500_v47 = vadd.s32 10, %v468_v45  ;;  %v499_v48 = vadd.s32 10, %v467_v46  ;;  %v470_v50 = vld [vmem:[%s2787_s27 + $0x48] sm:$0xff]  ;;  %v469_v51 = vld [vmem:[%s2787_s27 + $0x40] sm:$0xff]  ;;  %v471_v59 = vld [vmem:[%s2787_s27 + $0x50] sm:$0xff] }
  0x1d   : > { %v502_v53 = vadd.s32 10, %v470_v50  ;;  %v501_v54 = vadd.s32 10, %v469_v51  ;;  %v262_v56 = vld [vmem:[%s2775_s24 + $0x48] sm:$0xff]  ;;  %v503_v61 = vadd.s32 10, %v471_v59  ;;  %v264_v62 = vld [vmem:[%s2775_s24 + $0x58] sm:$0xff]  ;;  %v263_v63 = vld [vmem:[%s2775_s24 + $0x50] sm:$0xff]  ;;  %2704 = vmatpush.bf16.msrb.mxu3 %v2690_v60 }
  0x1e   : > { %v472_v0 = vld [vmem:[%s2787_s27 + $0x58] sm:$0xff]  ;;  %v266_v2 = vld [vmem:[%s2775_s24 + $0x68] sm:$0xff]  ;;  %v265_v3 = vld [vmem:[%s2775_s24 + $0x60] sm:$0xff] }
  0x1f   : > { %v504_v1 = vadd.s32 10, %v472_v0  ;;  %v474_v5 = vld [vmem:[%s2787_s27 + $0x68] sm:$0xff]  ;;  %v473_v6 = vld [vmem:[%s2787_s27 + $0x60] sm:$0xff]  ;;  %v476_v11 = vld [vmem:[%s2787_s27 + $0x78] sm:$0xff] }
  0x20   : > { %v506_v7 = vadd.s32 10, %v474_v5  ;;  %v475_v12 = vld [vmem:[%s2787_s27 + $0x70] sm:$0xff]  ;;  %v268_v19 = vld [vmem:[%s2775_s24 + $0x78] sm:$0xff]  ;;  %v478_v32 = vld [vmem:[%s2787_s27 + $0x88] sm:$0xff] }
  0x21   : > { %v507_v17 = vadd.s32 10, %v475_v12  ;;  %v271_v37 = vld [vmem:[%s2775_s24 + $0x90] sm:$0xff]  ;;  %v480_v41 = vld [vmem:[%s2787_s27 + $0x98] sm:$0xff]  ;;  %v482_v52 = vld [vmem:[%s2787_s27 + $0xa8] sm:$0xff] }
  0x22   : > { %598 = vperm.xlu2 %2719, %v517_v8   ;;  %379 = vperm.xlu1 %2718, %v284_v9   ;;  %v505_v8 = vadd.s32 10, %v473_v6  ;;  %v267_v9 = vld [vmem:[%s2775_s24 + $0x70] sm:$0xff]  ;;  %v514_v57 = vadd.s32 10, %v482_v52  ;;  %v276_v13 = vld [vmem:[%s2775_s24 + $0xb8] sm:$0xff] }
  0x23   : > { %376 = vperm.xlu0 %2717, %v283_v10   ;;  %v275_v12 = vld [vmem:[%s2775_s24 + $0xb0] sm:$0xff] }
  0x2a   : > { %607 = vperm.xlu2 %2719, %v520_v14   ;;  %604 = vperm.xlu1 %2718, %v519_v15  }
  0x2b   : > { %601 = vperm.xlu0 %2717, %v518_v16   ;;  %v508_v16 = vadd.s32 10, %v476_v11 }
  0x32   : > { %616 = vperm.xlu2 %2719, %v523_v20   ;;  %613 = vperm.xlu1 %2718, %v522_v21   ;;  %v477_v20 = vld [vmem:[%s2787_s27 + $0x80] sm:$0xff] }
  0x33   : > { %610 = vperm.xlu0 %2717, %v521_v22  }
  0x3a   : > { %289 = vperm.xlu2 %2719, %v254_v25   ;;  %286 = vperm.xlu1 %2718, %v253_v26   ;;  %v2730_v25 = vmov 0.0  }
  0x3b   : > { %619 = vperm.xlu0 %2717, %v524_v24   ;;  %v509_v24 = vadd.s32 10, %v477_v20 }
  0x42   : > { %292 = vperm.xlu2 %2719, %v255_v31   ;;  %529 = vperm.xlu1 %2718, %v494_v29   ;;  %v269_v29 = vld [vmem:[%s2775_s24 + $0x80] sm:$0xff] }
  0x43   : > { %526 = vperm.xlu0 %2717, %v493_v30   ;;  %v270_v30 = vld [vmem:[%s2775_s24 + $0x88] sm:$0xff] }
  0x4a   : > { %535 = vperm.xlu2 %2719, %v496_v34   ;;  %532 = vperm.xlu1 %2718, %v495_v35   ;;  %v510_v35 = vadd.s32 10, %v478_v32 }
  0x4b   : > { %295 = vperm.xlu0 %2717, %v256_v36   ;;  %v272_v36 = vld [vmem:[%s2775_s24 + $0x98] sm:$0xff] }
  0x52   : > { %538 = vperm.xlu2 %2719, %v497_v38   ;;  %301 = vperm.xlu1 %2718, %v258_v39  }
  0x53   : > { %298 = vperm.xlu0 %2717, %v257_v40   ;;  %v479_v40 = vld [vmem:[%s2787_s27 + $0x90] sm:$0xff] }
  0x5a   : > { %307 = vperm.xlu2 %2719, %v260_v43   ;;  %304 = vperm.xlu1 %2718, %v259_v44  }
  0x5b   : > { %541 = vperm.xlu0 %2717, %v498_v42  }
  0x62   : > { %310 = vperm.xlu2 %2719, %v261_v49   ;;  %547 = vperm.xlu1 %2718, %v500_v47   ;;  %v511_v47 = vadd.s32 10, %v479_v40  ;;  %v512_v49 = vadd.s32 10, %v480_v41 }
  0x63   : > { %544 = vperm.xlu0 %2717, %v499_v48   ;;  %v273_v48 = vld [vmem:[%s2775_s24 + $0xa0] sm:$0xff] }
  0x6a   : > { %553 = vperm.xlu2 %2719, %v502_v53   ;;  %550 = vperm.xlu1 %2718, %v501_v54   ;;  %v481_v54 = vld [vmem:[%s2787_s27 + $0xa0] sm:$0xff] }
  0x6b   : > { %313 = vperm.xlu0 %2717, %v262_v56   ;;  %v513_v59 = vadd.s32 10, %v481_v54 }
  0x6c   : > { %v2831_v4 = vpop.permute.xlu2 %370 }
  0x6d   : > { %vm409_vm10 = vcmp.eq.s32.totalorder %v2831_v4, %v2840_v18 }
  0x72   : > { %556 = vperm.xlu2 %2719, %v503_v61   ;;  %319 = vperm.xlu1 %2718, %v264_v62   ;;  %v274_v61 = vld [vmem:[%s2775_s24 + $0xa8] sm:$0xff] }
  0x73   : > { %316 = vperm.xlu0 %2717, %v263_v63   ;;  %v483_v63 = vld [vmem:[%s2787_s27 + $0xb0] sm:$0xff] }
  0x74   : > { %v2836_v10 = vpop.permute.xlu2 %373  ;;  %v515_v6 = vadd.s32 10, %v483_v63 }
  0x75   : > { %vm410_vm11 = vcmp.eq.s32.totalorder %v2836_v10, %v2840_v18 }
  0x7a   : > { %325 = vperm.xlu2 %2719, %v266_v2   ;;  %322 = vperm.xlu1 %2718, %v265_v3   ;;  %v442_v2 = vsel %vm410_vm11, 1.0, %v2730_v25 }
  0x7b   : > { %559 = vperm.xlu0 %2717, %v504_v1   ;;  %v441_v1 = vsel %vm409_vm10, 1.0, %v2730_v25 }
  0x7c   : > { %v2844_v21 = vpop.permute.xlu2 %598  ;;  %v459_v10 = vpack.c.bf16 %v442_v2, %v441_v1 }
  0x82   : > { %328 = vperm.xlu2 %2719, %v267_v9   ;;  %565 = vperm.xlu1 %2718, %v506_v7  }
  0x83   : > { %562 = vperm.xlu0 %2717, %v505_v8  }
  0x84   : > { %v365_v14 = vpop.permute.xlu1 %364  ;;  %v608_v34 = vpop.permute.xlu2 %607 }
  0x85   : > { %v359_v15 = vpop.permute.xlu0 %358  ;;  %vm648_vm4 = vcmp.eq.s32.totalorder %v608_v34, %v2840_v18  ;;  %vm407_vm5 = vcmp.eq.s32.totalorder %v365_v14, %v2840_v18 }
  0x86   : > { %vm405_vm1 = vcmp.eq.s32.totalorder %v359_v15, %v2840_v18  ;;  %v2864_v38 = vsel %vm648_vm4, 1.0, %v2730_v25  ;;  %v439_v42 = vsel %vm407_vm5, 1.0, %v2730_v25  ;;  %v484_v15 = vld [vmem:[%s2787_s27 + $0xb8] sm:$0xff] }
  0x87   : > { %v437_v26 = vsel %vm405_vm1, 1.0, %v2730_v25 }
  0x8a   : > { %571 = vperm.xlu2 %2719, %v508_v16   ;;  %568 = vperm.xlu1 %2718, %v507_v17  }
  0x8b   : > { %331 = vperm.xlu0 %2717, %v268_v19  }
  0x8c   : > { %v368_v22 = vpop.permute.xlu1 %367  ;;  %v617_v50 = vpop.permute.xlu2 %616 }
  0x8d   : > { %v362_v23 = vpop.permute.xlu0 %361  ;;  %vm408_vm6 = vcmp.eq.s32.totalorder %v368_v22, %v2840_v18  ;;  %vm651_vm13 = vcmp.eq.s32.totalorder %v617_v50, %v2840_v18  ;;  %v516_v22 = vadd.s32 10, %v484_v15  ;;  %v2694_v15 = vld [vmem:[%s4043_s3 + $0x18] sm:$0xff] }
  0x8e   : > { %vm406_vm2 = vcmp.eq.s32.totalorder %v362_v23, %v2840_v18  ;;  %v440_v43 = vsel %vm408_vm6, 1.0, %v2730_v25  ;;  %v2907_v7 = vsel %vm651_vm13, 1.0, %v2730_v25  ;;  %1176 = vmatpush.bf16.msra.mxu2 %v2694_v15 }
  0x8f   : > { %v438_v27 = vsel %vm406_vm2, 1.0, %v2730_v25  ;;  %v458_v51 = vpack.c.bf16 %v440_v43, %v439_v42 }
  0x90   : > { %v457_v28 = vpack.c.bf16 %v438_v27, %v437_v26 }
  0x92   : > { %2548 = vmatmul.msk.bf16.vlgmr.msra.gmra.mxu3 %vm713_vm3, %v457_v28  ;;  %574 = vperm.xlu2 %2719, %v509_v24  }
  0x93   : > { %334 = vperm.xlu0 %2717, %v269_v29   ;;  %337 = vperm.xlu1 %2718, %v270_v30  }
  0x94   : > { %v2853_v31 = vpop.permute.xlu1 %379  ;;  %v290_v62 = vpop.permute.xlu2 %289  ;;  %2705 = vmatpush.bf16.msra.mxu3 %v2694_v15 }
  0x95   : > { %v2856_v33 = vpop.permute.xlu0 %376  ;;  %vm382_vm12 = vcmp.eq.s32.totalorder %v290_v62, %v2840_v18  ;;  %vm412_vm2 = vcmp.eq.s32.totalorder %v2853_v31, %v2840_v18 }
  0x96   : > { %v414_v4 = vsel %vm382_vm12, 1.0, %v2730_v25  ;;  %vm411_vm4 = vcmp.eq.s32.totalorder %v2856_v33, %v2840_v18  ;;  %v444_v24 = vsel %vm412_vm2, 1.0, %v2730_v25 }
  0x97   : > { %v443_v26 = vsel %vm411_vm4, 1.0, %v2730_v25 }
  0x98   : > { %v460_v31 = vpack.c.bf16 %v444_v24, %v443_v26 }
  0x9a   : > { %343 = vperm.xlu2 %2719, %v272_v36  }
  0x9b   : > { %577 = vperm.xlu0 %2717, %v510_v35   ;;  %340 = vperm.xlu1 %2718, %v271_v37  }
  0x9c   : > { %v605_v39 = vpop.permute.xlu1 %604  ;;  %v293_v19 = vpop.permute.xlu2 %292 }
  0x9d   : > { %vm647_vm7 = vcmp.eq.s32.totalorder %v605_v39, %v2840_v18  ;;  %v2871_v44 = vpop.permute.xlu0 %601  ;;  %vm383_vm5 = vcmp.eq.s32.totalorder %v293_v19, %v2840_v18 }
  0x9e   : > { %v2874_v45 = vsel %vm647_vm7, 1.0, %v2730_v25  ;;  %v415_v29 = vsel %vm383_vm5, 1.0, %v2730_v25  ;;  %vm646_vm10 = vcmp.eq.s32.totalorder %v2871_v44, %v2840_v18 }
  0x9f   : > { %v698_v46 = vpack.c.bf16 %v2864_v38, %v2874_v45  ;;  %v678_v41 = vsel %vm646_vm10, 1.0, %v2730_v25 }
  0xa2   : > { %2549 = vmatmul.msk.bf16.gmra.mxu3 %vm713_vm3, %v458_v51  ;;  %346 = vperm.xlu2 %2719, %v273_v48  }
  0xa3   : > { %580 = vperm.xlu0 %2717, %v511_v47   ;;  %583 = vperm.xlu1 %2718, %v512_v49  }
  0xa4   : > { %v614_v53 = vpop.permute.xlu1 %613  ;;  %v536_v33 = vpop.permute.xlu2 %535 }
  0xa5   : > { %vm650_vm8 = vcmp.eq.s32.totalorder %v614_v53, %v2840_v18  ;;  %v611_v55 = vpop.permute.xlu0 %610 }
  0xa6   : > { %v2884_v56 = vsel %vm650_vm8, 1.0, %v2730_v25  ;;  %vm649_vm9 = vcmp.eq.s32.totalorder %v611_v55, %v2840_v18  ;;  %vm624_vm8 = vcmp.eq.s32.totalorder %v536_v33, %v2840_v18 }
  0xa7   : > { %v2888_v58 = vsel %vm649_vm9, 1.0, %v2730_v25  ;;  %v656_v36 = vsel %vm624_vm8, 1.0, %v2730_v25  ;;  %vm645_vm9 = vcmp.eq.s32.totalorder %v2844_v21, %v2840_v18 }
  0xa8   : > { %v699_v60 = vpack.c.bf16 %v2884_v56, %v2888_v58  ;;  %v677_v40 = vsel %vm645_vm9, 1.0, %v2730_v25 }
  0xa9   : > { %v697_v21 = vpack.c.bf16 %v678_v41, %v677_v40 }
  0xaa   : > { %589 = vperm.xlu2 %2719, %v514_v57  }
  0xab   : > { %349 = vperm.xlu0 %2717, %v274_v61   ;;  %586 = vperm.xlu1 %2718, %v513_v59  }
  0xac   : > { %v287_v0 = vpop.permute.xlu1 %286  ;;  %v539_v47 = vpop.permute.xlu2 %538 }
  0xad   : > { %v620_v3 = vpop.permute.xlu0 %619  ;;  %vm381_vm14 = vcmp.eq.s32.totalorder %v287_v0, %v2840_v18 }
  0xae   : > { %vm652_vm15 = vcmp.eq.s32.totalorder %v620_v3, %v2840_v18  ;;  %v413_v5 = vsel %vm381_vm14, 1.0, %v2730_v25  ;;  %vm625_vm14 = vcmp.eq.s32.totalorder %v539_v47, %v2840_v18 }
  0xaf   : > { %v2910_v8 = vsel %vm652_vm15, 1.0, %v2730_v25  ;;  %v445_v9 = vpack.c.bf16 %v414_v4, %v413_v5  ;;  %v657_v51 = vsel %vm625_vm14, 1.0, %v2730_v25 }
  0xb0   : > { %v700_v11 = vpack.c.bf16 %v2910_v8, %v2907_v7 }
  0xb1   : > { %2536 = vmatmul.msk.bf16.vlgmr.msra.gmra.mxu0 %vm713_vm3, %v445_v9 }
  0xb2   : > { %2550 = vmatmul.msk.bf16.gmra.mxu3 %vm713_vm3, %v459_v10  ;;  %592 = vperm.xlu2 %2719, %v515_v6  }
  0xb3   : > { %352 = vperm.xlu0 %2717, %v275_v12   ;;  %355 = vperm.xlu1 %2718, %v276_v13  }
  0xb4   : > { %v530_v14 = vpop.permute.xlu1 %529  ;;  %v308_v53 = vpop.permute.xlu2 %307 }
  0xb5   : > { %v527_v16 = vpop.permute.xlu0 %526  ;;  %vm622_vm0 = vcmp.eq.s32.totalorder %v530_v14, %v2840_v18 }
  0xb6   : > { %vm621_vm1 = vcmp.eq.s32.totalorder %v527_v16, %v2840_v18  ;;  %v654_v17 = vsel %vm622_vm0, 1.0, %v2730_v25  ;;  %vm388_vm0 = vcmp.eq.s32.totalorder %v308_v53, %v2840_v18 }
  0xb7   : > { %v653_v20 = vsel %vm621_vm1, 1.0, %v2730_v25  ;;  %v420_v57 = vsel %vm388_vm0, 1.0, %v2730_v25 }
  0xb8   : > { %v685_v23 = vpack.c.bf16 %v654_v17, %v653_v20 }
  0xba   : > { %2552 = vmatmul.msk.bf16.vlgmr.msra.gmra.mxu1 %vm713_vm3, %v685_v23 }
  0xbb   : > { %595 = vperm.xlu0 %2717, %v516_v22  }
  0xbc   : > { %v533_v28 = vpop.permute.xlu1 %532  ;;  %v311_v0 = vpop.permute.xlu2 %310 }
  0xbd   : > { %v296_v27 = vpop.permute.xlu0 %295  ;;  %vm623_vm7 = vcmp.eq.s32.totalorder %v533_v28, %v2840_v18  ;;  %vm389_vm5 = vcmp.eq.s32.totalorder %v311_v0, %v2840_v18 }
  0xbe   : > { %vm384_vm6 = vcmp.eq.s32.totalorder %v296_v27, %v2840_v18  ;;  %v655_v34 = vsel %vm623_vm7, 1.0, %v2730_v25  ;;  %v421_v38 = vsel %vm389_vm5, 1.0, %v2730_v25 }
  0xbf   : > { %v416_v30 = vsel %vm384_vm6, 1.0, %v2730_v25  ;;  %v686_v39 = vpack.c.bf16 %v656_v36, %v655_v34 }
  0xc0   : > { %v446_v32 = vpack.c.bf16 %v416_v30, %v415_v29 }
  0xc2   : > { %2537 = vmatmul.msk.bf16.gmra.mxu0 %vm713_vm3, %v446_v32  ;;  %2551 = vmatmul.msk.bf16.gmra.mxu3 %vm713_vm3, %v460_v31 }
  0xc4   : > { %v302_v37 = vpop.permute.xlu1 %301 }
  0xc5   : > { %v299_v35 = vpop.permute.xlu0 %298  ;;  %vm386_vm12 = vcmp.eq.s32.totalorder %v302_v37, %v2840_v18 }
  0xc6   : > { %vm385_vm11 = vcmp.eq.s32.totalorder %v299_v35, %v2840_v18  ;;  %v418_v43 = vsel %vm386_vm12, 1.0, %v2730_v25  ;;  %v2693_v35 = vld [vmem:[%s4043_s3 + $0x10] sm:$0xff] }
  0xc7   : > { %v417_v42 = vsel %vm385_vm11, 1.0, %v2730_v25  ;;  %1177 = vmatpush.bf16.msra.mxu2 %v2693_v35  ;;  %2706 = vmatpush.bf16.msra.mxu3 %v2693_v35 }
  0xc8   : > { %v447_v49 = vpack.c.bf16 %v418_v43, %v417_v42 }
  0xca   : > { %2553 = vmatmul.msk.bf16.gmra.mxu1 %vm713_vm3, %v686_v39 }
  0xcc   : > { %v305_v50 = vpop.permute.xlu1 %304 }
  0xcd   : > { %v542_v48 = vpop.permute.xlu0 %541  ;;  %vm387_vm15 = vcmp.eq.s32.totalorder %v305_v50, %v2840_v18 }
  0xce   : > { %vm626_vm13 = vcmp.eq.s32.totalorder %v542_v48, %v2840_v18  ;;  %v419_v54 = vsel %vm387_vm15, 1.0, %v2730_v25 }
  0xcf   : > { %v658_v44 = vsel %vm626_vm13, 1.0, %v2730_v25  ;;  %v448_v61 = vpack.c.bf16 %v420_v57, %v419_v54 }
  0xd0   : > { %v687_v52 = vpack.c.bf16 %v658_v44, %v657_v51 }
  0xd2   : > { %2538 = vmatmul.msk.bf16.gmra.mxu0 %vm713_vm3, %v447_v49  ;;  %2564 = vmatmul.msk.bf16.vlgmr.msrb.gmra.mxu3 %vm713_vm3, %v697_v21 }
  0xd4   : > { %v548_v59 = vpop.permute.xlu1 %547 }
  0xd5   : > { %v545_v55 = vpop.permute.xlu0 %544  ;;  %vm628_vm2 = vcmp.eq.s32.totalorder %v548_v59, %v2840_v18 }
  0xd6   : > { %vm627_vm1 = vcmp.eq.s32.totalorder %v545_v55, %v2840_v18  ;;  %v660_v63 = vsel %vm628_vm2, 1.0, %v2730_v25 }
  0xd7   : > { %v659_v62 = vsel %vm627_vm1, 1.0, %v2730_v25 }
  0xd8   : > { %v688_v2 = vpack.c.bf16 %v660_v63, %v659_v62 }
  0xda   : > { %2554 = vmatmul.msk.bf16.gmra.mxu1 %vm713_vm3, %v687_v52 }
  0xdc   : > { %v551_v4 = vpop.permute.xlu1 %550 }
  0xdd   : > { %v314_v1 = vpop.permute.xlu0 %313  ;;  %vm629_vm6 = vcmp.eq.s32.totalorder %v551_v4, %v2840_v18 }
  0xde   : > { %vm390_vm4 = vcmp.eq.s32.totalorder %v314_v1, %v2840_v18  ;;  %v661_v5 = vsel %vm629_vm6, 1.0, %v2730_v25 }
  0xdf   : > { %v422_v3 = vsel %vm390_vm4, 1.0, %v2730_v25 }
  0xe0   : > { %v449_v45 = vpack.c.bf16 %v422_v3, %v421_v38 }
  0xe2   : > { %2539 = vmatmul.msk.bf16.gmra.mxu0 %vm713_vm3, %v448_v61  ;;  %2565 = vmatmul.msk.bf16.gmra.mxu3 %vm713_vm3, %v698_v46  ;;  %v554_v46 = vpop.permute.xlu2 %553 }
  0xe3   : > { %vm630_vm7 = vcmp.eq.s32.totalorder %v554_v46, %v2840_v18 }
  0xe4   : > { %v662_v9 = vsel %vm630_vm7, 1.0, %v2730_v25  ;;  %v320_v10 = vpop.permute.xlu1 %319 }
  0xe5   : > { %v317_v6 = vpop.permute.xlu0 %316  ;;  %v689_v12 = vpack.c.bf16 %v662_v9, %v661_v5  ;;  %vm392_vm9 = vcmp.eq.s32.totalorder %v320_v10, %v2840_v18  ;;  %v2692_v10 = vld [vmem:[%s4043_s3 + $0x8] sm:$0xff] }
  0xe6   : > { %vm391_vm8 = vcmp.eq.s32.totalorder %v317_v6, %v2840_v18  ;;  %v424_v56 = vsel %vm392_vm9, 1.0, %v2730_v25  ;;  %1325 = vmatpush.bf16.msrb.mxu3 %v2692_v10 }
  0xe7   : > { %v423_v13 = vsel %vm391_vm8, 1.0, %v2730_v25 }
  0xe8   : > { %v450_v14 = vpack.c.bf16 %v424_v56, %v423_v13 }
  0xea   : > { %2555 = vmatmul.msk.bf16.gmra.mxu1 %vm713_vm3, %v688_v2  ;;  %v557_v58 = vpop.permute.xlu2 %556 }
  0xeb   : > { %vm631_vm11 = vcmp.eq.s32.totalorder %v557_v58, %v2840_v18 }
  0xec   : > { %v323_v17 = vpop.permute.xlu1 %322  ;;  %v663_v19 = vsel %vm631_vm11, 1.0, %v2730_v25  ;;  %vm1121_vm11 = vcmask 261120  }
  0xed   : > { %vm393_vm12 = vcmp.eq.s32.totalorder %v323_v17, %v2840_v18 }
  0xee   : > { %v425_v7 = vsel %vm393_vm12, 1.0, %v2730_v25 }
  0xf2   : > { %2540 = vmatmul.msk.bf16.gmra.mxu0 %vm713_vm3, %v449_v45  ;;  %2566 = vmatmul.msk.bf16.gmra.mxu3 %vm713_vm3, %v699_v60  ;;  %v560_v60 = vpop.permute.xlu0 %559  ;;  %v326_v22 = vpop.permute.xlu2 %325 }
  0xf3   : > { %vm632_vm10 = vcmp.eq.s32.totalorder %v560_v60, %v2840_v18  ;;  %vm394_vm13 = vcmp.eq.s32.totalorder %v326_v22, %v2840_v18 }
  0xf4   : > { %v664_v16 = vsel %vm632_vm10, 1.0, %v2730_v25  ;;  %v566_v23 = vpop.permute.xlu1 %565 }
  0xf5   : > { %v690_v20 = vpack.c.bf16 %v664_v16, %v663_v19  ;;  %vm634_vm15 = vcmp.eq.s32.totalorder %v566_v23, %v2840_v18 }
  0xf6   : > { %v666_v27 = vsel %vm634_vm15, 1.0, %v2730_v25 }
  0xfa   : > { %2556 = vmatmul.msk.bf16.gmra.mxu1 %vm713_vm3, %v689_v12  ;;  %v563_v8 = vpop.permute.xlu0 %562  ;;  %v329_v29 = vpop.permute.xlu2 %328 }
  0xfb   : > { %vm633_vm14 = vcmp.eq.s32.totalorder %v563_v8, %v2840_v18  ;;  %vm395_vm1 = vcmp.eq.s32.totalorder %v329_v29, %v2840_v18  ;;  %v2696_v29 = vld [vmem:[%s4043_s3 + $0x28] sm:$0xff] }
  0xfc   : > { %v665_v26 = vsel %vm633_vm14, 1.0, %v2730_v25  ;;  %v569_v33 = vpop.permute.xlu1 %568  ;;  %v427_v36 = vsel %vm395_vm1, 1.0, %v2730_v25  ;;  %1556 = vmatpush.bf16.msrb.mxu0 %v2696_v29 }
  0xfd   : > { %v691_v31 = vpack.c.bf16 %v666_v27, %v665_v26  ;;  %vm635_vm2 = vcmp.eq.s32.totalorder %v569_v33, %v2840_v18 }
  0xfe   : > { %v667_v40 = vsel %vm635_vm2, 1.0, %v2730_v25 }
 0x102   : > { %2541 = vmatmul.msk.bf16.gmra.mxu0 %vm713_vm3, %v450_v14  ;;  %2567 = vmatmul.msk.bf16.gmra.mxu3 %vm713_vm3, %v700_v11  ;;  %v426_v11 = vsel %vm394_vm13, 1.0, %v2730_v25  ;;  %v332_v30 = vpop.permute.xlu0 %331  ;;  %v572_v39 = vpop.permute.xlu2 %571 }
 0x103   : > { %v451_v24 = vpack.c.bf16 %v426_v11, %v425_v7  ;;  %vm396_vm0 = vcmp.eq.s32.totalorder %v332_v30, %v2840_v18  ;;  %vm636_vm4 = vcmp.eq.s32.totalorder %v572_v39, %v2840_v18 }
 0x104   : > { %v428_v32 = vsel %vm396_vm0, 1.0, %v2730_v25  ;;  %v668_v43 = vsel %vm636_vm4, 1.0, %v2730_v25 }
 0x105   : > { %v452_v37 = vpack.c.bf16 %v428_v32, %v427_v36  ;;  %v338_v47 = vpop.permute.xlu1 %337  ;;  %v692_v48 = vpack.c.bf16 %v668_v43, %v667_v40 }
 0x106   : > { %vm398_vm6 = vcmp.eq.s32.totalorder %v338_v47, %v2840_v18 }
 0x107   : > { %v430_v49 = vsel %vm398_vm6, 1.0, %v2730_v25 }
 0x10a   : > { %2557 = vmatmul.msk.bf16.gmra.mxu1 %vm713_vm3, %v690_v20  ;;  %v335_v41 = vpop.permute.xlu0 %334  ;;  %v575_v51 = vpop.permute.xlu2 %574 }
 0x10b   : > { %vm397_vm5 = vcmp.eq.s32.totalorder %v335_v41, %v2840_v18  ;;  %vm637_vm8 = vcmp.eq.s32.totalorder %v575_v51, %v2840_v18 }
 0x10c   : > { %v429_v21 = vsel %vm397_vm5, 1.0, %v2730_v25  ;;  %v669_v61 = vsel %vm637_vm8, 1.0, %v2730_v25 }
 0x10d   : > { %v453_v53 = vpack.c.bf16 %v430_v49, %v429_v21  ;;  %v341_v54 = vpop.permute.xlu1 %340 }
 0x10e   : > { %vm399_vm9 = vcmp.eq.s32.totalorder %v341_v54, %v2840_v18 }
 0x10f   : > { %v431_v3 = vsel %vm399_vm9, 1.0, %v2730_v25 }
 0x112   : > { %2542 = vmatmul.msk.bf16.gmra.mxu0 %vm713_vm3, %v451_v24  ;;  %v578_v52 = vpop.permute.xlu0 %577  ;;  %v344_v1 = vpop.permute.xlu2 %343 }
 0x113   : > { %vm638_vm7 = vcmp.eq.s32.totalorder %v578_v52, %v2840_v18  ;;  %vm400_vm10 = vcmp.eq.s32.totalorder %v344_v1, %v2840_v18 }
 0x114   : > { %v670_v55 = vsel %vm638_vm7, 1.0, %v2730_v25  ;;  %v432_v45 = vsel %vm400_vm10, 1.0, %v2730_v25 }
 0x115   : > { %v3012_v28 = vpop.f32.mrf.mxu3  ;;  %v693_v63 = vpack.c.bf16 %v670_v55, %v669_v61  ;;  %v584_v38 = vpop.permute.xlu1 %583  ;;  %v454_v6 = vpack.c.bf16 %v432_v45, %v431_v3  ;;  %v2691_v55 = vld [vmem:[%s4043_s3] sm:$0xff] }
 0x116   : > { %vm640_vm13 = vcmp.eq.s32.totalorder %v584_v38, %v2840_v18  ;;  %1326 = vmatpush.bf16.msrb.mxu3 %v2691_v55 }
 0x117   : > { %v672_v13 = vsel %vm640_vm13, 1.0, %v2730_v25 }
 0x11a   : > { %2558 = vmatmul.msk.bf16.gmra.mxu1 %vm713_vm3, %v691_v31  ;;  %v581_v2 = vpop.permute.xlu0 %580  ;;  %v347_v58 = vpop.permute.xlu2 %346 }
 0x11b   : > { %vm639_vm12 = vcmp.eq.s32.totalorder %v581_v2, %v2840_v18  ;;  %vm401_vm15 = vcmp.eq.s32.totalorder %v347_v58, %v2840_v18 }
 0x11c   : > { %v671_v12 = vsel %vm639_vm12, 1.0, %v2730_v25  ;;  %v433_v7 = vsel %vm401_vm15, 1.0, %v2730_v25 }
 0x11d   : > { %v3018_v34 = vpop.f32.mrf.mxu3  ;;  %v694_v16 = vpack.c.bf16 %v672_v13, %v671_v12  ;;  %v587_v19 = vpop.permute.xlu1 %586 }
 0x11e   : > { %vm641_vm0 = vcmp.eq.s32.totalorder %v587_v19, %v2840_v18 }
 0x11f   : > { %v673_v30 = vsel %vm641_vm0, 1.0, %v2730_v25 }
 0x122   : > { %2543 = vmatmul.msk.bf16.gmra.mxu0 %vm713_vm3, %v452_v37  ;;  %v350_v60 = vpop.permute.xlu0 %349  ;;  %v590_v26 = vpop.permute.xlu2 %589 }
 0x123   : > { %vm402_vm14 = vcmp.eq.s32.totalorder %v350_v60, %v2840_v18  ;;  %vm642_vm1 = vcmp.eq.s32.totalorder %v590_v26, %v2840_v18 }
 0x124   : > { %v434_v20 = vsel %vm402_vm14, 1.0, %v2730_v25  ;;  %v674_v35 = vsel %vm642_vm1, 1.0, %v2730_v25 }
 0x125   : > { %v3028_v42 = vpop.f32.mrf.mxu3  ;;  %v455_v23 = vpack.c.bf16 %v434_v20, %v433_v7  ;;  %v356_v32 = vpop.permute.xlu1 %355  ;;  %v695_v39 = vpack.c.bf16 %v674_v35, %v673_v30 }
 0x126   : > { %vm404_vm4 = vcmp.eq.s32.totalorder %v356_v32, %v2840_v18 }
 0x127   : > { %v436_v43 = vsel %vm404_vm4, 1.0, %v2730_v25 }
 0x12a   : > { %2559 = vmatmul.msk.bf16.gmra.mxu1 %vm713_vm3, %v692_v48  ;;  %v353_v27 = vpop.permute.xlu0 %352  ;;  %v593_v54 = vpop.permute.xlu2 %592 }
 0x12b   : > { %vm403_vm2 = vcmp.eq.s32.totalorder %v353_v27, %v2840_v18  ;;  %vm643_vm6 = vcmp.eq.s32.totalorder %v593_v54, %v2840_v18 }
 0x12c   : > { %v435_v41 = vsel %vm403_vm2, 1.0, %v2730_v25  ;;  %v675_v1 = vsel %vm643_vm6, 1.0, %v2730_v25 }
 0x12d   : > { %v3036_v44 = vpop.f32.mrf.mxu3  ;;  %v456_v52 = vpack.c.bf16 %v436_v43, %v435_v41 }
 0x12e   : > { %v3038_v50 = vpop.f32.mrf.mxu0 }
 0x132   : > { %2544 = vmatmul.msk.bf16.gmra.mxu0 %vm713_vm3, %v453_v53  ;;  %v596_v48 = vpop.permute.xlu0 %595 }
 0x133   : > { %vm644_vm5 = vcmp.eq.s32.totalorder %v596_v48, %v2840_v18 }
 0x134   : > { %v676_v61 = vsel %vm644_vm5, 1.0, %v2730_v25 }
 0x135   : > { %v3044_v57 = vpop.f32.mrf.mxu3  ;;  %v696_v38 = vpack.c.bf16 %v676_v61, %v675_v1 }
 0x136   : > { %v3046_v59 = vpop.f32.mrf.mxu0 }
 0x137   : > { %v912_v62 = vpop.f32.mrf.mxu1 }
 0x138   : > { %v3050_v0 = vmul.f32 %v912_v62, %v3038_v50 }
 0x13a   : > { %2560 = vmatmul.msk.bf16.gmra.mxu1 %vm713_vm3, %v693_v63 }
 0x13d   : > { %v3056_v4 = vpop.f32.mrf.mxu3 }
 0x13f   : > { %v3059_v46 = vpop.f32.mrf.mxu0  ;;  %v3061_v5 = vpop.f32.mrf.mxu1 }
 0x140   : > { %v1093_v9 = vpack.c.bf16 %v3061_v5, %v912_v62 }
 0x142   : > { %2545 = vmatmul.msk.bf16.gmra.mxu0 %vm713_vm3, %v454_v6  ;;  %2576 = vmatmul.msk.bf16.vlgmr.msra.gmra.mxu2 %vm1121_vm11, %v1093_v9 }
 0x145   : > { %v3073_v56 = vpop.f32.mrf.mxu3 }
 0x147   : > { %v3075_v14 = vpop.f32.mrf.mxu0  ;;  %v917_v15 = vpop.f32.mrf.mxu1 }
 0x148   : > { %v3078_v17 = vmul.f32 %v917_v15, %v3059_v46 }
 0x14a   : > { %2561 = vmatmul.msk.bf16.gmra.mxu1 %vm713_vm3, %v694_v16 }
 0x14d   : > { %v3084_v22 = vpop.f32.mrf.mxu3 }
 0x14f   : > { %v3087_v8 = vpop.f32.mrf.mxu0  ;;  %v3089_v11 = vpop.f32.mrf.mxu1 }
 0x150   : > { %v1094_v24 = vpack.c.bf16 %v3089_v11, %v917_v15 }
 0x152   : > { %2546 = vmatmul.msk.bf16.gmra.mxu0 %vm713_vm3, %v455_v23  ;;  %2577 = vmatmul.msk.bf16.gmra.mxu2 %vm1121_vm11, %v1094_v24 }
 0x155   : > { %v972_v31 = vpop.f32.mrf.mxu3 }
 0x156   : > { %v3101_v33 = vmul.f32 %v972_v31, %v3012_v28 }
 0x157   : > { %v3104_v36 = vpop.f32.mrf.mxu0  ;;  %v922_v37 = vpop.f32.mrf.mxu1 }
 0x158   : > { %4053 = vst [vmem:[#allocation3_spill] sm:$0xff] %v3101_v33  ;;  %v3107_v40 = vmul.f32 %v922_v37, %v3087_v8 }
 0x15a   : > { %2562 = vmatmul.msk.bf16.gmra.mxu1 %vm713_vm3, %v695_v39 }
 0x15d   : > { %v3114_v47 = vpop.f32.mrf.mxu3 }
 0x15e   : > { %4054 = vst [vmem:[#allocation4_spill] sm:$0xff] %v3114_v47  ;;  %v1105_v21 = vpack.c.bf16 %v3114_v47, %v972_v31  ;;  %v1045_v47 = vmul.f32 0.5, %v3050_v0  ;;  %v1047_v0 = vmul.f32 0.5, %v3078_v17  ;;  %v1049_v17 = vmul.f32 0.5, %v3107_v40 }
 0x15f   : > { %v3117_v49 = vpop.f32.mrf.mxu0  ;;  %v3119_v51 = vpop.f32.mrf.mxu1 }
 0x160   : > { %v1095_v53 = vpack.c.bf16 %v3119_v51, %v922_v37  ;;  %2588 = vmatmul.msk.bf16.vlgmr.msra.gmra.mxu3 %vm1121_vm11, %v1105_v21 }
 0x162   : > { %2547 = vmatmul.msk.bf16.gmra.mxu0 %vm713_vm3, %v456_v52  ;;  %2578 = vmatmul.msk.bf16.gmra.mxu2 %vm1121_vm11, %v1095_v53  ;;  %v1077_v52 = vpack.c.bf16 %v3046_v59, %v3038_v50 }
 0x165   : > { %v977_v62 = vpop.f32.mrf.mxu3 }
 0x166   : > { %v3132_v63 = vmul.f32 %v977_v62, %v3028_v42 }
 0x167   : > { %v3135_v2 = vpop.f32.mrf.mxu0  ;;  %v927_v3 = vpop.f32.mrf.mxu1 }
 0x168   : > { %4055 = vst [vmem:[#allocation5_spill] sm:$0xff] %v3132_v63  ;;  %v3138_v45 = vmul.f32 %v927_v3, %v3117_v49 }
 0x16a   : > { %2563 = vmatmul.msk.bf16.gmra.mxu1 %vm713_vm3, %v696_v38 }
 0x16d   : > { %v3141_v6 = vpop.f32.mrf.mxu3 }
 0x16e   : > { %4056 = vst [vmem:[#allocation6_spill] sm:$0xff] %v3141_v6  ;;  %v1106_v9 = vpack.c.bf16 %v3141_v6, %v977_v62 }
 0x16f   : > { %v3144_v10 = vpop.f32.mrf.mxu0  ;;  %v3146_v12 = vpop.f32.mrf.mxu1 }
 0x170   : > { %v1096_v13 = vpack.c.bf16 %v3146_v12, %v927_v3  ;;  %2589 = vmatmul.msk.bf16.gmra.mxu3 %vm1121_vm11, %v1106_v9  ;;  %v1078_v3 = vpack.c.bf16 %v3075_v14, %v3059_v46 }
 0x172   : > { %2579 = vmatmul.msk.bf16.gmra.mxu2 %vm1121_vm11, %v1096_v13  ;;  %v2695_v13 = vld [vmem:[%s4043_s3 + $0x20] sm:$0xff] }
 0x173   : > { %1557 = vmatpush.bf16.msrb.mxu0 %v2695_v13 }
 0x175   : > { %v982_v25 = vpop.f32.mrf.mxu3 }
 0x176   : > { %v3152_v58 = vmul.f32 %v982_v25, %v3044_v57 }
 0x177   : > { %v3154_v60 = vpop.f32.mrf.mxu0  ;;  %v932_v15 = vpop.f32.mrf.mxu1 }
 0x178   : > { %4057 = vst [vmem:[#allocation7_spill] sm:$0xff] %v3152_v58  ;;  %v3157_v16 = vmul.f32 %v932_v15, %v3144_v10 }
 0x17d   : > { %v3159_v19 = vpop.f32.mrf.mxu3 }
 0x17e   : > { %4058 = vst [vmem:[#allocation8_spill] sm:$0xff] %v3159_v19  ;;  %v1107_v20 = vpack.c.bf16 %v3159_v19, %v982_v25 }
 0x17f   : > { %v3162_v7 = vpop.f32.mrf.mxu0  ;;  %v3164_v23 = vpop.f32.mrf.mxu1 }
 0x180   : > { %v1097_v24 = vpack.c.bf16 %v3164_v23, %v932_v15  ;;  %2590 = vmatmul.msk.bf16.gmra.mxu3 %vm1121_vm11, %v1107_v20  ;;  %v1079_v20 = vpack.c.bf16 %v3104_v36, %v3087_v8  ;;  %v1080_v8 = vpack.c.bf16 %v3135_v2, %v3117_v49  ;;  %v2698_v49 = vld [vmem:[%s4043_s3 + $0x38] sm:$0xff] }
 0x181   : > { %1950 = vmatpush.bf16.msrb.mxu2 %v2698_v49  ;;  %v2700_v49 = vld [vmem:[%s4043_s3 + $0x48] sm:$0xff] }
 0x182   : > { %2580 = vmatmul.msk.bf16.gmra.mxu2 %vm1121_vm11, %v1097_v24  ;;  %1801 = vmatpush.bf16.msrb.mxu1 %v2700_v49 }
 0x185   : > { %v987_v26 = vpop.f32.mrf.mxu3 }
 0x186   : > { %v3170_v27 = vmul.f32 %v987_v26, %v3073_v56 }
 0x187   : > { %v3172_v29 = vpop.f32.mrf.mxu0  ;;  %v937_v30 = vpop.f32.mrf.mxu1 }
 0x188   : > { %4059 = vst [vmem:[#allocation9_spill] sm:$0xff] %v3170_v27  ;;  %v3175_v31 = vmul.f32 %v937_v30, %v3162_v7 }
 0x18d   : > { %v3177_v32 = vpop.f32.mrf.mxu3 }
 0x18e   : > { %4060 = vst [vmem:[#allocation10_spill] sm:$0xff] %v3177_v32  ;;  %v1108_v35 = vpack.c.bf16 %v3177_v32, %v987_v26 }
 0x18f   : > { %v3180_v37 = vpop.f32.mrf.mxu0  ;;  %v3182_v39 = vpop.f32.mrf.mxu1 }
 0x190   : > { %v1098_v41 = vpack.c.bf16 %v3182_v39, %v937_v30  ;;  %2591 = vmatmul.msk.bf16.gmra.mxu3 %vm1121_vm11, %v1108_v35 }
 0x192   : > { %2581 = vmatmul.msk.bf16.gmra.mxu2 %vm1121_vm11, %v1098_v41 }
 0x197   : > { %v3187_v43 = vpop.f32.mrf.mxu0  ;;  %v942_v48 = vpop.f32.mrf.mxu1 }
 0x198   : > { %v3190_v21 = vmul.f32 %v942_v48, %v3180_v37 }
 0x19f   : > { %v3194_v53 = vpop.f32.mrf.mxu0  ;;  %v3196_v54 = vpop.f32.mrf.mxu1 }
 0x1a0   : > { %v1099_v55 = vpack.c.bf16 %v3196_v54, %v942_v48  ;;  %2600 = vmatmul.msk.bf16.vlgmr.msrb.gmra.mxu3 %vm1121_vm11, %v1077_v52 }
 0x1a2   : > { %2582 = vmatmul.msk.bf16.gmra.mxu2 %vm1121_vm11, %v1099_v55 }
 0x1a7   : > { %v3201_v61 = vpop.f32.mrf.mxu0  ;;  %v947_v62 = vpop.f32.mrf.mxu1 }
 0x1a8   : > { %v3204_v1 = vmul.f32 %v947_v62, %v3194_v53 }
 0x1af   : > { %v3208_v50 = vpop.f32.mrf.mxu0  ;;  %v3210_v38 = vpop.f32.mrf.mxu1 }
 0x1b0   : > { %v1100_v9 = vpack.c.bf16 %v3210_v38, %v947_v62  ;;  %2601 = vmatmul.msk.bf16.gmra.mxu3 %vm1121_vm11, %v1078_v3 }
 0x1b2   : > { %2583 = vmatmul.msk.bf16.gmra.mxu2 %vm1121_vm11, %v1100_v9 }
 0x1b7   : > { %v3218_v25 = vpop.f32.mrf.mxu0  ;;  %v952_v15 = vpop.f32.mrf.mxu1 }
 0x1b8   : > { %v3221_v46 = vmul.f32 %v952_v15, %v3208_v50 }
 0x1bf   : > { %v3225_v24 = vpop.f32.mrf.mxu0  ;;  %v3227_v26 = vpop.f32.mrf.mxu1 }
 0x1c0   : > { %v1101_v30 = vpack.c.bf16 %v3227_v26, %v952_v15  ;;  %2602 = vmatmul.msk.bf16.gmra.mxu3 %vm1121_vm11, %v1079_v20 }
 0x1c2   : > { %2584 = vmatmul.msk.bf16.gmra.mxu2 %vm1121_vm11, %v1101_v30 }
 0x1c5   : > { %v3232_v35 = vpop.f32.mrf.mxu2 }
 0x1c7   : > { %v957_v41 = vpop.f32.mrf.mxu1  ;;  %v3237_v52 = vpop.f32.mrf.mxu0 }
 0x1c8   : > { %v3235_v48 = vmul.f32 %v957_v41, %v3225_v24 }
 0x1cd   : > { %v3239_v55 = vpop.f32.mrf.mxu2 }
 0x1cf   : > { %v3243_v62 = vpop.f32.mrf.mxu1  ;;  %v3248_v9 = vpop.f32.mrf.mxu0 }
 0x1d0   : > { %v1102_v3 = vpack.c.bf16 %v3243_v62, %v957_v41  ;;  %2603 = vmatmul.msk.bf16.gmra.mxu3 %vm1121_vm11, %v1080_v8  ;;  %v2697_v8 = vld [vmem:[%s4043_s3 + $0x30] sm:$0xff] }
 0x1d1   : > { %1951 = vmatpush.bf16.msrb.mxu2 %v2697_v8  ;;  %v1082_v8 = vpack.c.bf16 %v3172_v29, %v3162_v7 }
 0x1d2   : > { %2585 = vmatmul.msk.bf16.gmra.mxu2 %vm1121_vm11, %v1102_v3  ;;  %v1081_v3 = vpack.c.bf16 %v3154_v60, %v3144_v10 }
 0x1d5   : > { %v3250_v13 = vpop.f32.mrf.mxu2 }
 0x1d7   : > { %v962_v15 = vpop.f32.mrf.mxu1  ;;  %v3258_v30 = vpop.f32.mrf.mxu0 }
 0x1d8   : > { %v3253_v20 = vmul.f32 %v962_v15, %v3248_v9 }
 0x1dd   : > { %v3260_v41 = vpop.f32.mrf.mxu2 }
 0x1df   : > { %v3267_v18 = vpop.f32.mrf.mxu1  ;;  %v3279_v19 = vpop.f32.mrf.mxu0 }
 0x1e0   : > { %v1103_v27 = vpack.c.bf16 %v3267_v18, %v962_v15  ;;  %2604 = vmatmul.msk.bf16.gmra.mxu3 %vm1121_vm11, %v1081_v3 }
 0x1e2   : > { %2586 = vmatmul.msk.bf16.gmra.mxu2 %vm1121_vm11, %v1103_v27 }
 0x1e3   : > { %v3275_v32 = vpop.f32.mrf.mxu3 }
 0x1e4   : > { %4061 = vst [vmem:[#allocation11_spill] sm:$0xff] %v3275_v32  ;;  %v1014_v32 = vmul.f32 %v3061_v5, %v3046_v59  ;;  %v1016_v59 = vmul.f32 %v3089_v11, %v3075_v14  ;;  %v1018_v14 = vmul.f32 %v3119_v51, %v3104_v36  ;;  %v3341_v36 = vld [vmem:[%s4044_s4] sm:$0xff]  ;;  %v1020_v51 = vmul.f32 %v3146_v12, %v3135_v2 }
 0x1e5   : > { %v3277_v58 = vpop.f32.mrf.mxu2 }
 0x1e6   : > { %v1046_v7 = vmul.f32 0.5, %v1014_v32  ;;  %v1048_v32 = vmul.f32 0.5, %v1016_v59 }
 0x1e7   : > { %v967_v10 = vpop.f32.mrf.mxu1 }
 0x1e8   : > { %v3282_v63 = vmul.f32 %v967_v10, %v3279_v19 }
 0x1ea   : > { %4062 = vst [vmem:[#allocation12_spill] sm:$0xff] %v3282_v63  ;;  %v1083_v63 = vpack.c.bf16 %v3187_v43, %v3180_v37 }
 0x1eb   : > { %v3284_v15 = vpop.f32.mrf.mxu3 }
 0x1ec   : > { %4063 = vst [vmem:[#allocation13_spill] sm:$0xff] %v3284_v15 }
 0x1ed   : > { %v3288_v3 = vpop.f32.mrf.mxu2 }
 0x1ef   : > { %v3290_v6 = vpop.f32.mrf.mxu1 }
 0x1f0   : > { %v1104_v27 = vpack.c.bf16 %v3290_v6, %v967_v10  ;;  %2605 = vmatmul.msk.bf16.gmra.mxu3 %vm1121_vm11, %v1082_v8  ;;  %v1703_v10 = vpack.c.bf16 %v1046_v7, %v1045_v47  ;;  %v1084_v47 = vpack.c.bf16 %v3201_v61, %v3194_v53  ;;  %v1085_v53 = vpack.c.bf16 %v3218_v25, %v3208_v50 }
 0x1f1   : > { %v3347_v50 = vperm.slane %v3341_v36, 0 }
 0x1f2   : > { %2587 = vmatmul.msk.bf16.gmra.mxu2 %vm1121_vm11, %v1104_v27 }
 0x1f3   : > { %v3295_v49 = vpop.f32.mrf.mxu3 }
 0x1f5   : > { %v3299_v33 = vpop.f32.mrf.mxu2 }
 0x1fb   : > { %v3301_v15 = vpop.f32.mrf.mxu3 }
 0x1fc   : > { %4064 = vst [vmem:[#allocation14_spill] sm:$0xff] %v3301_v15 }
 0x1fd   : > { %v3307_v8 = vpop.f32.mrf.mxu2 }
 0x200   : > { %2606 = vmatmul.msk.bf16.gmra.mxu3 %vm1121_vm11, %v1083_v63  ;;  %v1704_v63 = vpack.c.bf16 %v1048_v32, %v1047_v0 }
 0x202   : > { %2672 = vmatmul.msk.bf16.vlgmr.msrb.gmra.mxu2 %vm1121_vm11, %v1703_v10  ;;  %v1050_v10 = vmul.f32 0.5, %v1018_v14  ;;  %v1052_v14 = vmul.f32 0.5, %v1020_v51 }
 0x203   : > { %v3310_v27 = vpop.f32.mrf.mxu3 }
 0x204   : > { %v1705_v59 = vpack.c.bf16 %v1050_v10, %v1049_v17 }
 0x205   : > { %v3316_v15 = vpop.f32.mrf.mxu2 }
 0x20b   : > { %v3314_v5 = vpop.f32.mrf.mxu3 }
 0x20d   : > { %v3325_v7 = vpop.f32.mrf.mxu2 }
 0x210   : > { %2607 = vmatmul.msk.bf16.gmra.mxu3 %vm1121_vm11, %v1084_v47 }
 0x212   : > { %2673 = vmatmul.msk.bf16.gmra.mxu2 %vm1121_vm11, %v1704_v63 }
 0x213   : > { %v3323_v37 = vpop.f32.mrf.mxu3 }
 0x214   : > { %4065 = vst [vmem:[#allocation15_spill] sm:$0xff] %v3323_v37 }
 0x215   : > { %v3334_v32 = vpop.f32.mrf.mxu2 }
 0x21b   : > { %v3329_v11 = vpop.f32.mrf.mxu3 }
 0x21c   : > { %4066 = vst [vmem:[#allocation16_spill] sm:$0xff] %v3329_v11 }
 0x21d   : > { %v3349_v47 = vpop.f32.mrf.mxu2 }
 0x220   : > { %2608 = vmatmul.msk.bf16.gmra.mxu3 %vm1121_vm11, %v1085_v53  ;;  %v1051_v53 = vmul.f32 0.5, %v3138_v45  ;;  %v1022_v45 = vmul.f32 %v3164_v23, %v3154_v60 }
 0x222   : > { %2674 = vmatmul.msk.bf16.gmra.mxu2 %vm1121_vm11, %v1705_v59  ;;  %v1086_v59 = vpack.c.bf16 %v3237_v52, %v3225_v24  ;;  %v1706_v12 = vpack.c.bf16 %v1052_v14, %v1051_v53 }
 0x223   : > { %v1328_v0 = vpop.f32.mrf.mxu3 }
 0x224   : > { %v1329_v40 = vadd.f32 %v1328_v0, %v3232_v35 }
 0x225   : > { %v3359_v37 = vpop.f32.mrf.mxu2 }
 0x226   : > { %v1409_v10 = vadd.f32 %v3347_v50, %v1329_v40  ;;  %v1054_v40 = vmul.f32 0.5, %v1022_v45 }
 0x228   : > { %v1441_v35 = vmax.f32 %v1409_v10, 0.0  ;;  %v1053_v10 = vmul.f32 0.5, %v3157_v16 }
 0x22b   : > { %v1330_v63 = vpop.f32.mrf.mxu3 }
 0x22c   : > { %v1331_v17 = vadd.f32 %v1330_v63, %v3239_v55 }
 0x22d   : > { %v3370_v53 = vpop.f32.mrf.mxu2 }
 0x22e   : > { %v1410_v2 = vadd.f32 %v3347_v50, %v1331_v17  ;;  %v1087_v17 = vpack.c.bf16 %v3258_v30, %v3248_v9  ;;  %v1024_v9 = vmul.f32 %v3182_v39, %v3172_v29 }
 0x230   : > { %v1442_v0 = vmax.f32 %v1410_v2, 0.0  ;;  %2609 = vmatmul.msk.bf16.gmra.mxu3 %vm1121_vm11, %v1086_v59  ;;  %v1707_v59 = vpack.c.bf16 %v1054_v40, %v1053_v10 }
 0x232   : > { %v1473_v11 = vpack.c.bf16 %v1442_v0, %v1441_v35  ;;  %2675 = vmatmul.msk.bf16.gmra.mxu2 %vm1121_vm11, %v1706_v12  ;;  %v3384_v35 = vpop.f32.mrf.mxu0 }
 0x233   : > { %v1333_v51 = vpop.f32.mrf.mxu3  ;;  %v1088_v40 = vpack.c.bf16 %v3384_v35, %v3279_v19 }
 0x234   : > { %2624 = vmatmul.msk.bf16.vlgmr.msrb.gmra.mxu0 %vm1121_vm11, %v1473_v11  ;;  %v1334_v24 = vadd.f32 %v1333_v51, %v3250_v13  ;;  %v2699_v13 = vld [vmem:[%s4043_s3 + $0x40] sm:$0xff]  ;;  %v1056_v51 = vmul.f32 0.5, %v1024_v9 }
 0x235   : > { %1802 = vmatpush.bf16.msrb.mxu1 %v2699_v13  ;;  %v1057_v13 = vmul.f32 0.5, %v3190_v21 }
 0x236   : > { %v1411_v63 = vadd.f32 %v3347_v50, %v1334_v24 }
 0x238   : > { %v1443_v2 = vmax.f32 %v1411_v63, 0.0 }
 0x23b   : > { %v1335_v55 = vpop.f32.mrf.mxu3 }
 0x23c   : > { %v1336_v14 = vadd.f32 %v1335_v55, %v3260_v41  ;;  %v3381_v41 = vpop.f32.mrf.mxu2  ;;  %v1055_v55 = vmul.f32 0.5, %v3175_v31  ;;  %v1026_v31 = vmul.f32 %v3196_v54, %v3187_v43 }
 0x23e   : > { %v1412_v11 = vadd.f32 %v3347_v50, %v1336_v14  ;;  %v1708_v29 = vpack.c.bf16 %v1056_v51, %v1055_v55  ;;  %v1090_v55 = vpack.c.bf16 %v3036_v44, %v3028_v42  ;;  %v1030_v42 = vmul.f32 %v3227_v26, %v3218_v25 }
 0x240   : > { %v1444_v60 = vmax.f32 %v1412_v11, 0.0  ;;  %2610 = vmatmul.msk.bf16.gmra.mxu3 %vm1121_vm11, %v1087_v17  ;;  %v1058_v11 = vmul.f32 0.5, %v1026_v31 }
 0x242   : > { %v1474_v23 = vpack.c.bf16 %v1444_v60, %v1443_v2  ;;  %2676 = vmatmul.msk.bf16.gmra.mxu2 %vm1121_vm11, %v1707_v59  ;;  %v1709_v9 = vpack.c.bf16 %v1058_v11, %v1057_v13  ;;  %v1061_v11 = vmul.f32 0.5, %v3221_v46 }
 0x243   : > { %v1338_v16 = vpop.f32.mrf.mxu3 }
 0x244   : > { %2625 = vmatmul.msk.bf16.gmra.mxu0 %vm1121_vm11, %v1474_v23  ;;  %v1339_v12 = vadd.f32 %v1338_v16, %v3277_v58  ;;  %v3393_v58 = vpop.f32.mrf.mxu2  ;;  %v1089_v23 = vpack.c.bf16 %v3018_v34, %v3012_v28  ;;  %v1028_v28 = vmul.f32 %v3210_v38, %v3201_v61 }
 0x246   : > { %v1413_v45 = vadd.f32 %v3347_v50, %v1339_v12  ;;  %v1060_v51 = vmul.f32 0.5, %v1028_v28 }
 0x248   : > { %v1445_v39 = vmax.f32 %v1413_v45, 0.0 }
 0x24b   : > { %v1340_v0 = vpop.f32.mrf.mxu3 }
 0x24c   : > { %v1341_v24 = vadd.f32 %v1340_v0, %v3288_v3  ;;  %v3400_v59 = vpop.f32.mrf.mxu2 }
 0x24e   : > { %v1414_v63 = vadd.f32 %v3347_v50, %v1341_v24 }
 0x250   : > { %v1446_v14 = vmax.f32 %v1414_v63, 0.0  ;;  %2611 = vmatmul.msk.bf16.gmra.mxu3 %vm1121_vm11, %v1088_v40  ;;  %v1059_v40 = vmul.f32 0.5, %v3204_v1 }
 0x252   : > { %v1475_v10 = vpack.c.bf16 %v1446_v14, %v1445_v39  ;;  %2677 = vmatmul.msk.bf16.gmra.mxu2 %vm1121_vm11, %v1708_v29  ;;  %v1710_v29 = vpack.c.bf16 %v1060_v51, %v1059_v40  ;;  %v1065_v40 = vmul.f32 0.5, %v3253_v20 }
 0x253   : > { %v1343_v17 = vpop.f32.mrf.mxu3 }
 0x254   : > { %2626 = vmatmul.msk.bf16.gmra.mxu0 %vm1121_vm11, %v1475_v10  ;;  %v1344_v19 = vadd.f32 %v1343_v17, %v3299_v33  ;;  %v3411_v0 = vpop.f32.mrf.mxu2  ;;  %v1062_v17 = vmul.f32 0.5, %v1030_v42 }
 0x256   : > { %v1415_v2 = vadd.f32 %v3347_v50, %v1344_v19 }
 0x258   : > { %v1447_v12 = vmax.f32 %v1415_v2, 0.0 }
 0x25b   : > { %v1345_v3 = vpop.f32.mrf.mxu3 }
 0x25c   : > { %v1346_v60 = vadd.f32 %v1345_v3, %v3307_v8  ;;  %v3422_v39 = vpop.f32.mrf.mxu2  ;;  %v1091_v3 = vpack.c.bf16 %v3056_v4, %v3044_v57  ;;  %v1032_v57 = vmul.f32 %v3243_v62, %v3237_v52 }
 0x25e   : > { %v1416_v16 = vadd.f32 %v3347_v50, %v1346_v60  ;;  %v1711_v60 = vpack.c.bf16 %v1062_v17, %v1061_v11  ;;  %v4067_v17 = vld [vmem:[#allocation12_spill] sm:$0xff] }
 0x260   : > { %v1448_v43 = vmax.f32 %v1416_v16, 0.0  ;;  %2612 = vmatmul.msk.bf16.gmra.mxu3 %vm1121_vm11, %v1089_v23  ;;  %v1064_v16 = vmul.f32 0.5, %v1032_v57 }
 0x262   : > { %v1476_v33 = vpack.c.bf16 %v1448_v43, %v1447_v12  ;;  %2678 = vmatmul.msk.bf16.gmra.mxu2 %vm1121_vm11, %v1709_v9  ;;  %v1092_v43 = vpack.c.bf16 %v3084_v22, %v3073_v56  ;;  %v1034_v56 = vmul.f32 %v3267_v18, %v3258_v30 }
 0x263   : > { %v1348_v54 = vpop.f32.mrf.mxu3 }
 0x264   : > { %2627 = vmatmul.msk.bf16.gmra.mxu0 %vm1121_vm11, %v1476_v33  ;;  %v1349_v21 = vadd.f32 %v1348_v54, %v3316_v15  ;;  %v1063_v33 = vmul.f32 0.5, %v3235_v48 }
 0x266   : > { %v1417_v45 = vadd.f32 %v3347_v50, %v1349_v21  ;;  %v1712_v21 = vpack.c.bf16 %v1064_v16, %v1063_v33 }
 0x268   : > { %v1449_v14 = vmax.f32 %v1417_v45, 0.0  ;;  %v1066_v45 = vmul.f32 0.5, %v1034_v56 }
 0x26b   : > { %v1350_v8 = vpop.f32.mrf.mxu3 }
 0x26c   : > { %v1351_v24 = vadd.f32 %v1350_v8, %v3325_v7  ;;  %v3430_v7 = vpop.f32.mrf.mxu2 }
 0x26e   : > { %v1418_v63 = vadd.f32 %v3347_v50, %v1351_v24 }
 0x270   : > { %v1450_v61 = vmax.f32 %v1418_v63, 0.0  ;;  %2613 = vmatmul.msk.bf16.gmra.mxu3 %vm1121_vm11, %v1090_v55 }
 0x272   : > { %v1477_v38 = vpack.c.bf16 %v1450_v61, %v1449_v14  ;;  %2679 = vmatmul.msk.bf16.gmra.mxu2 %vm1121_vm11, %v1710_v29  ;;  %v1713_v29 = vpack.c.bf16 %v1066_v45, %v1065_v40 }
 0x273   : > { %v1353_v15 = vpop.f32.mrf.mxu3 }
 0x274   : > { %2628 = vmatmul.msk.bf16.gmra.mxu0 %vm1121_vm11, %v1477_v38  ;;  %v1354_v1 = vadd.f32 %v1353_v15, %v3334_v32  ;;  %v3440_v13 = vpop.f32.mrf.mxu2 }
 0x276   : > { %v1419_v31 = vadd.f32 %v3347_v50, %v1354_v1 }
 0x278   : > { %v1451_v23 = vmax.f32 %v1419_v31, 0.0  ;;  %v1067_v31 = vmul.f32 0.5, %v4067_v17 }
 0x27b   : > { %v1355_v10 = vpop.f32.mrf.mxu3 }
 0x27c   : > { %v1356_v19 = vadd.f32 %v1355_v10, %v3349_v47  ;;  %v3451_v54 = vpop.f32.mrf.mxu2 }
 0x27e   : > { %v1420_v2 = vadd.f32 %v3347_v50, %v1356_v19 }
 0x280   : > { %v1452_v25 = vmax.f32 %v1420_v2, 0.0  ;;  %2614 = vmatmul.msk.bf16.gmra.mxu3 %vm1121_vm11, %v1091_v3 }
 0x282   : > { %v1478_v26 = vpack.c.bf16 %v1452_v25, %v1451_v23  ;;  %2680 = vmatmul.msk.bf16.gmra.mxu2 %vm1121_vm11, %v1711_v60  ;;  %v4068_v25 = vld [vmem:[#allocation4_spill] sm:$0xff] }
 0x283   : > { %v1358_v32 = vpop.f32.mrf.mxu3 }
 0x284   : > { %2629 = vmatmul.msk.bf16.gmra.mxu0 %vm1121_vm11, %v1478_v26  ;;  %v1359_v46 = vadd.f32 %v1358_v32, %v3359_v37  ;;  %v1038_v26 = vmul.f32 %v4068_v25, %v3018_v34 }
 0x286   : > { %v1421_v9 = vadd.f32 %v3347_v50, %v1359_v46 }
 0x288   : > { %v1453_v8 = vmax.f32 %v1421_v9, 0.0  ;;  %v1070_v9 = vmul.f32 0.5, %v1038_v26 }
 0x28b   : > { %v1360_v47 = vpop.f32.mrf.mxu3 }
 0x28c   : > { %v1361_v12 = vadd.f32 %v1360_v47, %v3370_v53  ;;  %v3459_v53 = vpop.f32.mrf.mxu2 }
 0x28e   : > { %v1422_v28 = vadd.f32 %v3347_v50, %v1361_v12 }
 0x290   : > { %v1454_v52 = vmax.f32 %v1422_v28, 0.0  ;;  %2615 = vmatmul.msk.bf16.gmra.mxu3 %vm1121_vm11, %v1092_v43  ;;  %v4069_v28 = vld [vmem:[#allocation3_spill] sm:$0xff] }
 0x292   : > { %v1479_v62 = vpack.c.bf16 %v1454_v52, %v1453_v8  ;;  %2681 = vmatmul.msk.bf16.gmra.mxu2 %vm1121_vm11, %v1712_v21  ;;  %v1069_v21 = vmul.f32 0.5, %v4069_v28 }
 0x293   : > { %v1363_v37 = vpop.f32.mrf.mxu3 }
 0x294   : > { %2630 = vmatmul.msk.bf16.gmra.mxu0 %vm1121_vm11, %v1479_v62  ;;  %v1364_v48 = vadd.f32 %v1363_v37, %v3381_v41  ;;  %v3466_v38 = vpop.f32.mrf.mxu2  ;;  %v1036_v41 = vmul.f32 %v3290_v6, %v3384_v35  ;;  %v3480_v6 = vperm.slane %v3341_v36, 1  ;;  %v1715_v34 = vpack.c.bf16 %v1070_v9, %v1069_v21 }
 0x296   : > { %v1423_v24 = vadd.f32 %v3347_v50, %v1364_v48  ;;  %v1068_v20 = vmul.f32 0.5, %v1036_v41 }
 0x298   : > { %v1455_v14 = vmax.f32 %v1423_v24, 0.0  ;;  %v1714_v3 = vpack.c.bf16 %v1068_v20, %v1067_v31 }
 0x29b   : > { %v1365_v51 = vpop.f32.mrf.mxu3 }
 0x29c   : > { %v1366_v55 = vadd.f32 %v1365_v51, %v3393_v58  ;;  %v3473_v42 = vpop.f32.mrf.mxu2 }
 0x29e   : > { %v1424_v63 = vadd.f32 %v3347_v50, %v1366_v55  ;;  %v4070_v55 = vld [vmem:[#allocation6_spill] sm:$0xff] }
 0x29f   : > { %v1040_v40 = vmul.f32 %v4070_v55, %v3036_v44  ;;  %v4075_v55 = vld [vmem:[#allocation11_spill] sm:$0xff] }
 0x2a0   : > { %v1456_v61 = vmax.f32 %v1424_v63, 0.0 }
 0x2a1   : > { %v1072_v41 = vmul.f32 0.5, %v1040_v40 }
 0x2a2   : > { %v1480_v18 = vpack.c.bf16 %v1456_v61, %v1455_v14  ;;  %2682 = vmatmul.msk.bf16.gmra.mxu2 %vm1121_vm11, %v1713_v29 }
 0x2a3   : > { %v1368_v30 = vpop.f32.mrf.mxu3 }
 0x2a4   : > { %2631 = vmatmul.msk.bf16.gmra.mxu0 %vm1121_vm11, %v1480_v18  ;;  %v1369_v58 = vadd.f32 %v1368_v30, %v3400_v59  ;;  %v3484_v59 = vpop.f32.mrf.mxu2 }
 0x2a6   : > { %v1425_v1 = vadd.f32 %v3347_v50, %v1369_v58 }
 0x2a8   : > { %v1457_v11 = vmax.f32 %v1425_v1, 0.0  ;;  %v4071_v1 = vld [vmem:[#allocation5_spill] sm:$0xff] }
 0x2ab   : > { %v1370_v15 = vpop.f32.mrf.mxu3 }
 0x2ac   : > { %v1371_v10 = vadd.f32 %v1370_v15, %v3411_v0  ;;  %v3495_v37 = vpop.f32.mrf.mxu2 }
 0x2ae   : > { %v1426_v19 = vadd.f32 %v3347_v50, %v1371_v10  ;;  %v1071_v10 = vmul.f32 0.5, %v4071_v1  ;;  %v4077_v1 = vld [vmem:[#allocation9_spill] sm:$0xff] }
 0x2b0   : > { %v1458_v2 = vmax.f32 %v1426_v19, 0.0 }
 0x2b1   : > { %v1559_v60 = vpop.f32.mrf.mxu0 }
 0x2b2   : > { %v1481_v23 = vpack.c.bf16 %v1458_v2, %v1457_v11  ;;  %2683 = vmatmul.msk.bf16.gmra.mxu2 %vm1121_vm11, %v1714_v3  ;;  %v1560_v0 = vadd.f32 %v1559_v60, %v3480_v6 }
 0x2b3   : > { %v1373_v35 = vpop.f32.mrf.mxu3 }
 0x2b4   : > { %2632 = vmatmul.msk.bf16.gmra.mxu0 %vm1121_vm11, %v1481_v23  ;;  %v1374_v32 = vadd.f32 %v1373_v35, %v3422_v39  ;;  %v1639_v46 = vmax.f32 %v1560_v0, 0.0  ;;  %v3504_v14 = vpop.f32.mrf.mxu2  ;;  %v4072_v0 = vld [vmem:[#allocation8_spill] sm:$0xff] }
 0x2b5   : > { %v1042_v25 = vmul.f32 %v4072_v0, %v3056_v4 }
 0x2b6   : > { %v1427_v12 = vadd.f32 %v3347_v50, %v1374_v32  ;;  %v1671_v8 = vmul.f32 0.5, %v1639_v46 }
 0x2b8   : > { %v1459_v39 = vmax.f32 %v1427_v12, 0.0 }
 0x2b9   : > { %v1561_v57 = vpop.f32.mrf.mxu0 }
 0x2ba   : > { %v1562_v47 = vadd.f32 %v1561_v57, %v3480_v6 }
 0x2bb   : > { %v1375_v16 = vpop.f32.mrf.mxu3 }
 0x2bc   : > { %v1640_v43 = vmax.f32 %v1562_v47, 0.0  ;;  %v1376_v33 = vadd.f32 %v1375_v16, %v3430_v7  ;;  %v3513_v35 = vpop.f32.mrf.mxu2  ;;  %v1074_v16 = vmul.f32 0.5, %v1042_v25 }
 0x2be   : > { %v1672_v52 = vmul.f32 0.5, %v1640_v43  ;;  %v1428_v62 = vadd.f32 %v3347_v50, %v1376_v33  ;;  %v4073_v33 = vld [vmem:[#allocation7_spill] sm:$0xff] }
 0x2bf   : > { %v1073_v28 = vmul.f32 0.5, %v4073_v33 }
 0x2c0   : > { %v1719_v56 = vpack.c.bf16 %v1672_v52, %v1671_v8  ;;  %v1460_v48 = vmax.f32 %v1428_v62, 0.0 }
 0x2c1   : > { %v1564_v51 = vpop.f32.mrf.mxu0 }
 0x2c2   : > { %v1482_v45 = vpack.c.bf16 %v1460_v48, %v1459_v39  ;;  %2648 = vmatmul.msk.bf16.vlgmr.msrb.gmra.mxu1 %vm1121_vm11, %v1719_v56  ;;  %2684 = vmatmul.msk.bf16.gmra.mxu2 %vm1121_vm11, %v1715_v34  ;;  %v1565_v7 = vadd.f32 %v1564_v51, %v3480_v6 }
 0x2c3   : > { %v1378_v24 = vpop.f32.mrf.mxu3 }
 0x2c4   : > { %2633 = vmatmul.msk.bf16.gmra.mxu0 %vm1121_vm11, %v1482_v45  ;;  %v1379_v63 = vadd.f32 %v1378_v24, %v3440_v13  ;;  %v1641_v61 = vmax.f32 %v1565_v7, 0.0  ;;  %v1716_v13 = vpack.c.bf16 %v1072_v41, %v1071_v10  ;;  %v3524_v21 = vpop.f32.mrf.mxu2  ;;  %v4074_v45 = vld [vmem:[#allocation10_spill] sm:$0xff]  ;;  %v1075_v10 = vmul.f32 0.5, %v4077_v1 }
 0x2c5   : > { %v1044_v24 = vmul.f32 %v4074_v45, %v3084_v22 }
 0x2c6   : > { %v1429_v58 = vadd.f32 %v3347_v50, %v1379_v63  ;;  %v1673_v17 = vmul.f32 0.5, %v1641_v61 }
 0x2c8   : > { %v1461_v19 = vmax.f32 %v1429_v58, 0.0 }
 0x2c9   : > { %v1566_v29 = vpop.f32.mrf.mxu0 }
 0x2ca   : > { %v1567_v18 = vadd.f32 %v1566_v29, %v3480_v6 }
 0x2cb   : > { %v1380_v30 = vpop.f32.mrf.mxu3 }
 0x2cc   : > { %v1642_v15 = vmax.f32 %v1567_v18, 0.0  ;;  %v1381_v20 = vadd.f32 %v1380_v30, %v3451_v54  ;;  %v3533_v7 = vpop.f32.mrf.mxu2  ;;  %v1076_v30 = vmul.f32 0.5, %v1044_v24 }
 0x2ce   : > { %v1674_v31 = vmul.f32 0.5, %v1642_v15  ;;  %v1430_v44 = vadd.f32 %v3347_v50, %v1381_v20  ;;  %v4076_v15 = vld [vmem:[#allocation13_spill] sm:$0xff] }
 0x2d0   : > { %v1720_v3 = vpack.c.bf16 %v1674_v31, %v1673_v17  ;;  %v1462_v11 = vmax.f32 %v1430_v44, 0.0  ;;  %v1718_v44 = vpack.c.bf16 %v1076_v30, %v1075_v10 }
 0x2d1   : > { %v1569_v2 = vpop.f32.mrf.mxu0 }
 0x2d2   : > { %v1483_v60 = vpack.c.bf16 %v1462_v11, %v1461_v19  ;;  %2649 = vmatmul.msk.bf16.gmra.mxu1 %vm1121_vm11, %v1720_v3  ;;  %2685 = vmatmul.msk.bf16.gmra.mxu2 %vm1121_vm11, %v1716_v13  ;;  %v1570_v54 = vadd.f32 %v1569_v2, %v3480_v6 }
 0x2d3   : > { %v1383_v23 = vpop.f32.mrf.mxu3 }
 0x2d4   : > { %2634 = vmatmul.msk.bf16.gmra.mxu0 %vm1121_vm11, %v1483_v60  ;;  %v1384_v26 = vadd.f32 %v1383_v23, %v3459_v53  ;;  %v1643_v57 = vmax.f32 %v1570_v54, 0.0  ;;  %v1717_v53 = vpack.c.bf16 %v1074_v16, %v1073_v28  ;;  %v3541_v2 = vpop.f32.mrf.mxu2  ;;  %v4078_v16 = vld [vmem:[#allocation14_spill] sm:$0xff] }
 0x2d6   : > { %v1431_v9 = vadd.f32 %v3347_v50, %v1384_v26  ;;  %v1675_v8 = vmul.f32 0.5, %v1643_v57 }
 0x2d8   : > { %v1463_v62 = vmax.f32 %v1431_v9, 0.0 }
 0x2d9   : > { %v1571_v32 = vpop.f32.mrf.mxu0 }
 0x2da   : > { %v1572_v46 = vadd.f32 %v1571_v32, %v3480_v6 }
 0x2db   : > { %v1385_v47 = vpop.f32.mrf.mxu3 }
 0x2dc   : > { %v1644_v12 = vmax.f32 %v1572_v46, 0.0  ;;  %v1386_v43 = vadd.f32 %v1385_v47, %v3466_v38 }
 0x2de   : > { %v1676_v52 = vmul.f32 0.5, %v1644_v12  ;;  %v1432_v4 = vadd.f32 %v3347_v50, %v1386_v43 }
 0x2e0   : > { %v1721_v34 = vpack.c.bf16 %v1676_v52, %v1675_v8  ;;  %v1464_v39 = vmax.f32 %v1432_v4, 0.0 }
 0x2e1   : > { %v1574_v56 = vpop.f32.mrf.mxu0 }
 0x2e2   : > { %v1484_v48 = vpack.c.bf16 %v1464_v39, %v1463_v62  ;;  %2650 = vmatmul.msk.bf16.gmra.mxu1 %vm1121_vm11, %v1721_v34  ;;  %2686 = vmatmul.msk.bf16.gmra.mxu2 %vm1121_vm11, %v1717_v53  ;;  %v1575_v38 = vadd.f32 %v1574_v56, %v3480_v6 }
 0x2e3   : > { %v1388_v51 = vpop.f32.mrf.mxu3 }
 0x2e4   : > { %2635 = vmatmul.msk.bf16.gmra.mxu0 %vm1121_vm11, %v1484_v48  ;;  %v1389_v40 = vadd.f32 %v1388_v51, %v4075_v55  ;;  %v1645_v29 = vmax.f32 %v1575_v38, 0.0 }
 0x2e6   : > { %v1433_v41 = vadd.f32 %v3347_v50, %v1389_v40  ;;  %v1677_v17 = vmul.f32 0.5, %v1645_v29 }
 0x2e8   : > { %v1465_v13 = vmax.f32 %v1433_v41, 0.0 }
 0x2e9   : > { %v1576_v63 = vpop.f32.mrf.mxu0 }
 0x2ea   : > { %v1577_v61 = vadd.f32 %v1576_v63, %v3480_v6 }
 0x2eb   : > { %v1390_v18 = vpop.f32.mrf.mxu3 }
 0x2ec   : > { %v1646_v58 = vmax.f32 %v1577_v61, 0.0  ;;  %v1391_v20 = vadd.f32 %v1390_v18, %v4076_v15  ;;  %v4079_v15 = vld [vmem:[#allocation15_spill] sm:$0xff] }
 0x2ee   : > { %v1678_v31 = vmul.f32 0.5, %v1646_v58  ;;  %v1434_v22 = vadd.f32 %v3347_v50, %v1391_v20 }
 0x2f0   : > { %v1722_v19 = vpack.c.bf16 %v1678_v31, %v1677_v17  ;;  %v1466_v3 = vmax.f32 %v1434_v22, 0.0 }
 0x2f1   : > { %v1579_v11 = vpop.f32.mrf.mxu0 }
 0x2f2   : > { %v1485_v60 = vpack.c.bf16 %v1466_v3, %v1465_v13  ;;  %2651 = vmatmul.msk.bf16.gmra.mxu1 %vm1121_vm11, %v1722_v19  ;;  %2687 = vmatmul.msk.bf16.gmra.mxu2 %vm1121_vm11, %v1718_v44  ;;  %v1580_v54 = vadd.f32 %v1579_v11, %v3480_v6  ;;  %v4080_v44 = vld [vmem:[#allocation16_spill] sm:$0xff] }
 0x2f3   : > { %v1393_v23 = vpop.f32.mrf.mxu3 }
 0x2f4   : > { %2636 = vmatmul.msk.bf16.gmra.mxu0 %vm1121_vm11, %v1485_v60  ;;  %v1394_v0 = vadd.f32 %v1393_v23, %v3295_v49  ;;  %v1647_v26 = vmax.f32 %v1580_v54, 0.0 }
 0x2f6   : > { %v1435_v46 = vadd.f32 %v3347_v50, %v1394_v0  ;;  %v1679_v12 = vmul.f32 0.5, %v1647_v26 }
 0x2f8   : > { %v1467_v28 = vmax.f32 %v1435_v46, 0.0 }
 0x2f9   : > { %v1581_v25 = vpop.f32.mrf.mxu0 }
 0x2fa   : > { %v1582_v32 = vadd.f32 %v1581_v25, %v3480_v6 }
 0x2fb   : > { %v1395_v57 = vpop.f32.mrf.mxu3 }
 0x2fc   : > { %v1648_v47 = vmax.f32 %v1582_v32, 0.0  ;;  %v1396_v9 = vadd.f32 %v1395_v57, %v4078_v16 }
 0x2fe   : > { %v1680_v43 = vmul.f32 0.5, %v1648_v47  ;;  %v1436_v33 = vadd.f32 %v3347_v50, %v1396_v9 }
 0x300   : > { %v1723_v8 = vpack.c.bf16 %v1680_v43, %v1679_v12  ;;  %v1468_v52 = vmax.f32 %v1436_v33, 0.0 }
 0x301   : > { %v1584_v4 = vpop.f32.mrf.mxu0 }
 0x302   : > { %v1486_v53 = vpack.c.bf16 %v1468_v52, %v1467_v28  ;;  %2652 = vmatmul.msk.bf16.gmra.mxu1 %vm1121_vm11, %v1723_v8  ;;  %v1585_v62 = vadd.f32 %v1584_v4, %v3480_v6 }
 0x303   : > { %v1398_v49 = vpop.f32.mrf.mxu3 }
 0x304   : > { %2637 = vmatmul.msk.bf16.gmra.mxu0 %vm1121_vm11, %v1486_v53  ;;  %v1399_v34 = vadd.f32 %v1398_v49, %v3310_v27  ;;  %v1649_v56 = vmax.f32 %v1585_v62, 0.0  ;;  %v3576_v49 = vperm.slane %v3341_v36, 2 }
 0x306   : > { %v1437_v38 = vadd.f32 %v3347_v50, %v1399_v34  ;;  %v1681_v55 = vmul.f32 0.5, %v1649_v56  ;;  %v3580_v56 = vperm.slane %v3341_v36, 3 }
 0x308   : > { %v1469_v29 = vmax.f32 %v1437_v38, 0.0 }
 0x309   : > { %v1586_v39 = vpop.f32.mrf.mxu0 }
 0x30a   : > { %v1587_v48 = vadd.f32 %v1586_v39, %v3480_v6 }
 0x30b   : > { %v1400_v51 = vpop.f32.mrf.mxu3 }
 0x30c   : > { %v1650_v45 = vmax.f32 %v1587_v48, 0.0  ;;  %v1401_v24 = vadd.f32 %v1400_v51, %v3314_v5 }
 0x30e   : > { %v1682_v40 = vmul.f32 0.5, %v1650_v45  ;;  %v1438_v63 = vadd.f32 %v3347_v50, %v1401_v24 }
 0x310   : > { %v1724_v61 = vpack.c.bf16 %v1682_v40, %v1681_v55  ;;  %v1470_v18 = vmax.f32 %v1438_v63, 0.0 }
 0x311   : > { %v1589_v30 = vpop.f32.mrf.mxu0 }
 0x312   : > { %v1487_v41 = vpack.c.bf16 %v1470_v18, %v1469_v29  ;;  %2653 = vmatmul.msk.bf16.gmra.mxu1 %vm1121_vm11, %v1724_v61  ;;  %v1590_v58 = vadd.f32 %v1589_v30, %v3480_v6 }
 0x313   : > { %v1403_v27 = vpop.f32.mrf.mxu3 }
 0x314   : > { %2638 = vmatmul.msk.bf16.gmra.mxu0 %vm1121_vm11, %v1487_v41  ;;  %v1404_v20 = vadd.f32 %v1403_v27, %v4079_v15  ;;  %v1651_v5 = vmax.f32 %v1590_v58, 0.0 }
 0x316   : > { %v1439_v31 = vadd.f32 %v3347_v50, %v1404_v20  ;;  %v1683_v19 = vmul.f32 0.5, %v1651_v5 }
 0x318   : > { %v1471_v60 = vmax.f32 %v1439_v31, 0.0 }
 0x319   : > { %v1591_v1 = vpop.f32.mrf.mxu0 }
 0x31a   : > { %v1592_v10 = vadd.f32 %v1591_v1, %v3480_v6 }
 0x31b   : > { %v1405_v17 = vpop.f32.mrf.mxu3 }
 0x31c   : > { %v1652_v22 = vmax.f32 %v1592_v10, 0.0  ;;  %v1406_v13 = vadd.f32 %v1405_v17, %v4080_v44 }
 0x31e   : > { %v1684_v3 = vmul.f32 0.5, %v1652_v22  ;;  %v1440_v11 = vadd.f32 %v3347_v50, %v1406_v13 }
 0x320   : > { %v1725_v23 = vpack.c.bf16 %v1684_v3, %v1683_v19  ;;  %v1472_v54 = vmax.f32 %v1440_v11, 0.0 }
 0x321   : > { %v1594_v0 = vpop.f32.mrf.mxu0 }
 0x322   : > { %v1488_v25 = vpack.c.bf16 %v1472_v54, %v1471_v60  ;;  %2654 = vmatmul.msk.bf16.gmra.mxu1 %vm1121_vm11, %v1725_v23  ;;  %v1595_v26 = vadd.f32 %v1594_v0, %v3480_v6 }
 0x324   : > { %2639 = vmatmul.msk.bf16.gmra.mxu0 %vm1121_vm11, %v1488_v25  ;;  %v1653_v57 = vmax.f32 %v1595_v26, 0.0 }
 0x326   : > { %v1685_v16 = vmul.f32 0.5, %v1653_v57 }
 0x329   : > { %v1596_v32 = vpop.f32.mrf.mxu0 }
 0x32a   : > { %v1597_v46 = vadd.f32 %v1596_v32, %v3480_v6 }
 0x32c   : > { %v1654_v47 = vmax.f32 %v1597_v46, 0.0 }
 0x32e   : > { %v1686_v9 = vmul.f32 0.5, %v1654_v47 }
 0x330   : > { %v1726_v12 = vpack.c.bf16 %v1686_v9, %v1685_v16 }
 0x331   : > { %v1599_v50 = vpop.f32.mrf.mxu0 }
 0x332   : > { %2655 = vmatmul.msk.bf16.gmra.mxu1 %vm1121_vm11, %v1726_v12  ;;  %v1600_v43 = vadd.f32 %v1599_v50, %v3480_v6 }
 0x334   : > { %v1655_v28 = vmax.f32 %v1600_v43, 0.0 }
 0x336   : > { %v1687_v4 = vmul.f32 0.5, %v1655_v28 }
 0x339   : > { %v1601_v33 = vpop.f32.mrf.mxu0 }
 0x33a   : > { %v1602_v8 = vadd.f32 %v1601_v33, %v3480_v6 }
 0x33c   : > { %v1656_v52 = vmax.f32 %v1602_v8, 0.0 }
 0x33e   : > { %v1688_v53 = vmul.f32 0.5, %v1656_v52 }
 0x33f   : > { %v1804_v62 = vpop.f32.mrf.mxu1 }
 0x340   : > { %v1727_v34 = vpack.c.bf16 %v1688_v53, %v1687_v4  ;;  %v1954_v39 = vadd.f32 %v3473_v42, %v1804_v62  ;;  %v1973_v53 = vpop.f32.mrf.mxu2 }
 0x341   : > { %v1604_v48 = vpop.f32.mrf.mxu0 }
 0x342   : > { %v3583_v51 = vadd.f32 %v3576_v49, %v1954_v39  ;;  %2656 = vmatmul.msk.bf16.gmra.mxu1 %vm1121_vm11, %v1727_v34  ;;  %v1605_v45 = vadd.f32 %v1604_v48, %v3480_v6 }
 0x344   : > { %v2067_v38 = vmul.f32 %v3580_v56, %v3583_v51  ;;  %v1657_v36 = vmax.f32 %v1605_v45, 0.0 }
 0x346   : > { %v2099_v24 = vsel %vm1121_vm11, %v2067_v38, 0.0  ;;  %v1689_v30 = vmul.f32 0.5, %v1657_v36 }
 0x347   : > { %2100 = vadd.xlane.f32.xlu1 %v2099_v24  ;;  %v1806_v55 = vpop.f32.mrf.mxu1 }
 0x348   : > { %v1956_v42 = vadd.f32 %v3484_v59, %v1806_v55 }
 0x349   : > { %v1606_v40 = vpop.f32.mrf.mxu0 }
 0x34a   : > { %v3592_v63 = vadd.f32 %v3576_v49, %v1956_v42  ;;  %v1607_v29 = vadd.f32 %v1606_v40, %v3480_v6  ;;  %v1975_v40 = vpop.f32.mrf.mxu2 }
 0x34c   : > { %v1658_v61 = vmax.f32 %v1607_v29, 0.0  ;;  %v2068_v18 = vmul.f32 %v3580_v56, %v3592_v63 }
 0x34e   : > { %v1690_v41 = vmul.f32 0.5, %v1658_v61  ;;  %v2102_v27 = vsel %vm1121_vm11, %v2068_v18, 0.0 }
 0x34f   : > { %2103 = vadd.xlane.f32.xlu2 %v2102_v27  ;;  %v1809_v58 = vpop.f32.mrf.mxu1 }
 0x350   : > { %v1728_v15 = vpack.c.bf16 %v1690_v41, %v1689_v30  ;;  %v1959_v59 = vadd.f32 %v3495_v37, %v1809_v58 }
 0x351   : > { %v1609_v20 = vpop.f32.mrf.mxu0 }
 0x352   : > { %v3600_v1 = vadd.f32 %v3576_v49, %v1959_v59  ;;  %2657 = vmatmul.msk.bf16.gmra.mxu1 %vm1121_vm11, %v1728_v15  ;;  %v1610_v10 = vadd.f32 %v1609_v20, %v3480_v6 }
 0x354   : > { %v2069_v5 = vmul.f32 %v3580_v56, %v3600_v1  ;;  %v1659_v13 = vmax.f32 %v1610_v10, 0.0  ;;  %v1978_v10 = vpop.f32.mrf.mxu2 }
 0x356   : > { %v2105_v17 = vsel %vm1121_vm11, %v2069_v5, 0.0  ;;  %v1691_v60 = vmul.f32 0.5, %v1659_v13 }
 0x357   : > { %2106 = vadd.xlane.f32.xlu0 %v2105_v17  ;;  %v1811_v31 = vpop.f32.mrf.mxu1 }
 0x358   : > { %v1961_v22 = vadd.f32 %v3504_v14, %v1811_v31 }
 0x359   : > { %v1611_v44 = vpop.f32.mrf.mxu0 }
 0x35a   : > { %v3609_v37 = vadd.f32 %v3576_v49, %v1961_v22  ;;  %v1612_v19 = vadd.f32 %v1611_v44, %v3480_v6 }
 0x35c   : > { %v1660_v3 = vmax.f32 %v1612_v19, 0.0  ;;  %v2070_v11 = vmul.f32 %v3580_v56, %v3609_v37 }
 0x35e   : > { %v1692_v23 = vmul.f32 0.5, %v1660_v3  ;;  %v2108_v54 = vsel %vm1121_vm11, %v2070_v11, 0.0 }
 0x35f   : > { %2109 = vadd.xlane.f32.xlu2 %v2108_v54  ;;  %v1814_v0 = vpop.f32.mrf.mxu1 }
 0x360   : > { %v1729_v25 = vpack.c.bf16 %v1692_v23, %v1691_v60  ;;  %v1964_v14 = vadd.f32 %v3513_v35, %v1814_v0  ;;  %v1980_v0 = vpop.f32.mrf.mxu2 }
 0x361   : > { %v1614_v26 = vpop.f32.mrf.mxu0 }
 0x362   : > { %v3617_v32 = vadd.f32 %v3576_v49, %v1964_v14  ;;  %2658 = vmatmul.msk.bf16.gmra.mxu1 %vm1121_vm11, %v1729_v25  ;;  %v1615_v46 = vadd.f32 %v1614_v26, %v3480_v6 }
 0x364   : > { %v2071_v57 = vmul.f32 %v3580_v56, %v3617_v32  ;;  %v1661_v50 = vmax.f32 %v1615_v46, 0.0 }
 0x366   : > { %v2111_v47 = vsel %vm1121_vm11, %v2071_v57, 0.0  ;;  %v1693_v8 = vmul.f32 0.5, %v1661_v50 }
 0x367   : > { %2112 = vadd.xlane.f32.xlu1 %v2111_v47  ;;  %v1816_v16 = vpop.f32.mrf.mxu1 }
 0x368   : > { %v1966_v9 = vadd.f32 %v3524_v21, %v1816_v16 }
 0x369   : > { %v1616_v12 = vpop.f32.mrf.mxu0 }
 0x36a   : > { %v3626_v35 = vadd.f32 %v3576_v49, %v1966_v9  ;;  %v1617_v43 = vadd.f32 %v1616_v12, %v3480_v6 }
 0x36c   : > { %v1662_v33 = vmax.f32 %v1617_v43, 0.0  ;;  %v2072_v28 = vmul.f32 %v3580_v56, %v3626_v35 }
 0x36e   : > { %v1694_v52 = vmul.f32 0.5, %v1662_v33  ;;  %v2114_v4 = vsel %vm1121_vm11, %v2072_v28, 0.0  ;;  %v1983_v33 = vpop.f32.mrf.mxu2 }
 0x36f   : > { %2115 = vadd.xlane.f32.xlu2 %v2114_v4  ;;  %v1819_v62 = vpop.f32.mrf.mxu1 }
 0x370   : > { %v1730_v34 = vpack.c.bf16 %v1694_v52, %v1693_v8  ;;  %v1969_v21 = vadd.f32 %v3533_v7, %v1819_v62 }
 0x371   : > { %v1619_v39 = vpop.f32.mrf.mxu0 }
 0x372   : > { %v3634_v48 = vadd.f32 %v3576_v49, %v1969_v21  ;;  %2659 = vmatmul.msk.bf16.gmra.mxu1 %vm1121_vm11, %v1730_v34  ;;  %v1620_v45 = vadd.f32 %v1619_v39, %v3480_v6 }
 0x374   : > { %v2073_v38 = vmul.f32 %v3580_v56, %v3634_v48  ;;  %v1663_v7 = vmax.f32 %v1620_v45, 0.0 }
 0x376   : > { %v2117_v24 = vsel %vm1121_vm11, %v2073_v38, 0.0  ;;  %v1695_v41 = vmul.f32 0.5, %v1663_v7 }
 0x377   : > { %2118 = vadd.xlane.f32.xlu0 %v2117_v24  ;;  %v1821_v55 = vpop.f32.mrf.mxu1 }
 0x378   : > { %v1971_v42 = vadd.f32 %v3541_v2, %v1821_v55 }
 0x379   : > { %v1621_v36 = vpop.f32.mrf.mxu0 }
 0x37a   : > { %v3643_v29 = vadd.f32 %v3576_v49, %v1971_v42  ;;  %v1622_v61 = vadd.f32 %v1621_v36, %v3480_v6 }
 0x37c   : > { %v1664_v18 = vmax.f32 %v1622_v61, 0.0  ;;  %v2074_v30 = vmul.f32 %v3580_v56, %v3643_v29 }
 0x37e   : > { %v1696_v27 = vmul.f32 0.5, %v1664_v18  ;;  %v2120_v58 = vsel %vm1121_vm11, %v2074_v30, 0.0 }
 0x37f   : > { %2121 = vadd.xlane.f32.xlu1 %v2120_v58  ;;  %v1824_v15 = vpop.f32.mrf.mxu1 }
 0x380   : > { %v1731_v59 = vpack.c.bf16 %v1696_v27, %v1695_v41  ;;  %v1974_v2 = vadd.f32 %v1973_v53, %v1824_v15 }
 0x381   : > { %v1624_v20 = vpop.f32.mrf.mxu0 }
 0x382   : > { %v3650_v5 = vadd.f32 %v3576_v49, %v1974_v2  ;;  %2660 = vmatmul.msk.bf16.gmra.mxu1 %vm1121_vm11, %v1731_v59  ;;  %v1625_v31 = vadd.f32 %v1624_v20, %v3480_v6 }
 0x384   : > { %v2075_v17 = vmul.f32 %v3580_v56, %v3650_v5  ;;  %v1665_v3 = vmax.f32 %v1625_v31, 0.0 }
 0x386   : > { %v2123_v22 = vsel %vm1121_vm11, %v2075_v17, 0.0  ;;  %v1697_v25 = vmul.f32 0.5, %v1665_v3 }
 0x387   : > { %2124 = vadd.xlane.f32.xlu2 %v2123_v22  ;;  %v1826_v44 = vpop.f32.mrf.mxu1 }
 0x388   : > { %v1976_v13 = vadd.f32 %v1975_v40, %v1826_v44  ;;  %v1985_v40 = vpop.f32.mrf.mxu2 }
 0x389   : > { %v1626_v19 = vpop.f32.mrf.mxu0 }
 0x38a   : > { %v3658_v11 = vadd.f32 %v3576_v49, %v1976_v13  ;;  %v1627_v60 = vadd.f32 %v1626_v19, %v3480_v6 }
 0x38c   : > { %v1666_v23 = vmax.f32 %v1627_v60, 0.0  ;;  %v2076_v54 = vmul.f32 %v3580_v56, %v3658_v11 }
 0x38e   : > { %v1698_v14 = vmul.f32 0.5, %v1666_v23  ;;  %v2126_v26 = vsel %vm1121_vm11, %v2076_v54, 0.0 }
 0x38f   : > { %2127 = vadd.xlane.f32.xlu0 %v2126_v26  ;;  %v1829_v57 = vpop.f32.mrf.mxu1 }
 0x390   : > { %v1732_v46 = vpack.c.bf16 %v1698_v14, %v1697_v25  ;;  %v1979_v47 = vadd.f32 %v1978_v10, %v1829_v57  ;;  %v1988_v20 = vpop.f32.mrf.mxu2 }
 0x391   : > { %v1629_v16 = vpop.f32.mrf.mxu0 }
 0x392   : > { %v3665_v9 = vadd.f32 %v3576_v49, %v1979_v47  ;;  %2661 = vmatmul.msk.bf16.gmra.mxu1 %vm1121_vm11, %v1732_v46  ;;  %v1630_v50 = vadd.f32 %v1629_v16, %v3480_v6 }
 0x394   : > { %v2077_v12 = vmul.f32 %v3580_v56, %v3665_v9  ;;  %v1667_v4 = vmax.f32 %v1630_v50, 0.0 }
 0x396   : > { %v2129_v43 = vsel %vm1121_vm11, %v2077_v12, 0.0  ;;  %v1699_v39 = vmul.f32 0.5, %v1667_v4 }
 0x397   : > { %2130 = vadd.xlane.f32.xlu1 %v2129_v43  ;;  %v1831_v28 = vpop.f32.mrf.mxu1 }
 0x398   : > { %v1981_v8 = vadd.f32 %v1980_v0, %v1831_v28  ;;  %v1990_v23 = vpop.f32.mrf.mxu2 }
 0x399   : > { %v1631_v52 = vpop.f32.mrf.mxu0 }
 0x39a   : > { %v3673_v53 = vadd.f32 %v3576_v49, %v1981_v8  ;;  %v1632_v62 = vadd.f32 %v1631_v52, %v3480_v6 }
 0x39c   : > { %v1668_v34 = vmax.f32 %v1632_v62, 0.0  ;;  %v2078_v21 = vmul.f32 %v3580_v56, %v3673_v53 }
 0x39e   : > { %v1700_v38 = vmul.f32 0.5, %v1668_v34  ;;  %v2132_v45 = vsel %vm1121_vm11, %v2078_v21, 0.0 }
 0x39f   : > { %2133 = vadd.xlane.f32.xlu2 %v2132_v45  ;;  %v1834_v24 = vpop.f32.mrf.mxu1 }
 0x3a0   : > { %v1733_v55 = vpack.c.bf16 %v1700_v38, %v1699_v39  ;;  %v1984_v42 = vadd.f32 %v1983_v33, %v1834_v24  ;;  %v1993_v46 = vpop.f32.mrf.mxu2  ;;  %v2720_v33 = vld [vmem:[%s4044_s4] sm:$0xff] }
 0x3a1   : > { %v1634_v36 = vpop.f32.mrf.mxu0  ;;  %v3716_v28 = vperm.slane %v2720_v33, 4 }
 0x3a2   : > { %v3680_v7 = vadd.f32 %v3576_v49, %v1984_v42  ;;  %2662 = vmatmul.msk.bf16.gmra.mxu1 %vm1121_vm11, %v1733_v55  ;;  %v1635_v18 = vadd.f32 %v1634_v36, %v3480_v6 }
 0x3a4   : > { %v2079_v61 = vmul.f32 %v3580_v56, %v3680_v7  ;;  %v1669_v15 = vmax.f32 %v1635_v18, 0.0 }
 0x3a6   : > { %v2135_v30 = vsel %vm1121_vm11, %v2079_v61, 0.0  ;;  %v1701_v31 = vmul.f32 0.5, %v1669_v15 }
 0x3a7   : > { %2136 = vadd.xlane.f32.xlu0 %v2135_v30  ;;  %v1836_v41 = vpop.f32.mrf.mxu1 }
 0x3a8   : > { %v1986_v27 = vadd.f32 %v1985_v40, %v1836_v41  ;;  %v1995_v24 = vpop.f32.mrf.mxu2 }
 0x3a9   : > { %v1636_v58 = vpop.f32.mrf.mxu0 }
 0x3aa   : > { %v3688_v59 = vadd.f32 %v3576_v49, %v1986_v27  ;;  %v1637_v2 = vadd.f32 %v1636_v58, %v3480_v6 }
 0x3ac   : > { %v1670_v10 = vmax.f32 %v1637_v2, 0.0  ;;  %v2080_v17 = vmul.f32 %v3580_v56, %v3688_v59 }
 0x3ae   : > { %v1702_v22 = vmul.f32 0.5, %v1670_v10  ;;  %v2138_v44 = vsel %vm1121_vm11, %v2080_v17, 0.0 }
 0x3af   : > { %2139 = vadd.xlane.f32.xlu1 %v2138_v44  ;;  %v1839_v13 = vpop.f32.mrf.mxu1 }
 0x3b0   : > { %v1734_v19 = vpack.c.bf16 %v1702_v22, %v1701_v31  ;;  %v1989_v3 = vadd.f32 %v1988_v20, %v1839_v13  ;;  %v1998_v36 = vpop.f32.mrf.mxu2 }
 0x3b2   : > { %v3695_v60 = vadd.f32 %v3576_v49, %v1989_v3  ;;  %2663 = vmatmul.msk.bf16.gmra.mxu1 %vm1121_vm11, %v1734_v19 }
 0x3b4   : > { %v2081_v6 = vmul.f32 %v3580_v56, %v3695_v60 }
 0x3b6   : > { %v2141_v54 = vsel %vm1121_vm11, %v2081_v6, 0.0 }
 0x3b7   : > { %2142 = vadd.xlane.f32.xlu2 %v2141_v54  ;;  %v1841_v0 = vpop.f32.mrf.mxu1 }
 0x3b8   : > { %v1991_v25 = vadd.f32 %v1990_v23, %v1841_v0  ;;  %v2000_v27 = vpop.f32.mrf.mxu2 }
 0x3ba   : > { %v3702_v14 = vadd.f32 %v3576_v49, %v1991_v25  ;;  %v2101_v8 = vpop.xlane.xlu1 %2100 }
 0x3bb   : > { %v2196_v52 = vadd.f32 %v3716_v28, %v2101_v8 }
 0x3bc   : > { %v2082_v26 = vmul.f32 %v3580_v56, %v3702_v14 }
 0x3be   : > { %v2144_v57 = vsel %vm1121_vm11, %v2082_v26, 0.0 }
 0x3bf   : > { %2145 = vadd.xlane.f32.xlu0 %v2144_v57  ;;  %v1844_v47 = vpop.f32.mrf.mxu1 }
 0x3c0   : > { %v1994_v16 = vadd.f32 %v1993_v46, %v1844_v47  ;;  %v2003_v26 = vpop.f32.mrf.mxu2 }
 0x3c2   : > { %v3708_v12 = vadd.f32 %v3576_v49, %v1994_v16  ;;  %v2104_v4 = vpop.xlane.xlu2 %2103  ;;  %v4081_v16 = vld [vmem:[#allocation2_spill] sm:$0xff] }
 0x3c3   : > { %v2197_v62 = vadd.f32 %v3716_v28, %v2104_v4  ;;  %vm2228_vm3 = vcmp.eq.s32.totalorder %v4081_v16, 16 }
 0x3c4   : > { %v2083_v50 = vmul.f32 %v3580_v56, %v3708_v12 }
 0x3c6   : > { %v2147_v43 = vsel %vm1121_vm11, %v2083_v50, 0.0 }
 0x3c7   : > { %2148 = vadd.xlane.f32.xlu1 %v2147_v43  ;;  %v1846_v45 = vpop.f32.mrf.mxu1 }
 0x3c8   : > { %v1996_v55 = vadd.f32 %v1995_v24, %v1846_v45  ;;  %v2005_v4 = vpop.f32.mrf.mxu2 }
 0x3ca   : > { %v2107_v39 = vpop.xlane.xlu0 %2106  ;;  %v3723_v42 = vadd.f32 %v3576_v49, %v1996_v55 }
 0x3cb   : > { %v2198_v38 = vadd.f32 %v3716_v28, %v2107_v39 }
 0x3cc   : > { %v2084_v61 = vmul.f32 %v3580_v56, %v3723_v42 }
 0x3ce   : > { %v2150_v18 = vsel %vm1121_vm11, %v2084_v61, 0.0 }
 0x3cf   : > { %2231 = vperm.xlu2 %2719, %v2196_v52   ;;  %v1849_v40 = vpop.f32.mrf.mxu1 }
 0x3d0   : > { %v1999_v30 = vadd.f32 %v1998_v36, %v1849_v40  ;;  %v2008_v55 = vpop.f32.mrf.mxu2 }
 0x3d2   : > { %v2110_v34 = vpop.xlane.xlu2 %2109  ;;  %v3729_v58 = vadd.f32 %v3576_v49, %v1999_v30 }
 0x3d3   : > { %2236 = vperm.xlu0 %2717, %v2197_v62   ;;  %v2199_v21 = vadd.f32 %v3716_v28, %v2110_v34 }
 0x3d4   : > { %v2085_v2 = vmul.f32 %v3580_v56, %v3729_v58 }
 0x3d6   : > { %v2153_v10 = vsel %vm1121_vm11, %v2085_v2, 0.0 }
 0x3d7   : > { %v1851_v41 = vpop.f32.mrf.mxu1 }
 0x3d8   : > { %v2001_v15 = vadd.f32 %v2000_v27, %v1851_v41 }
 0x3da   : > { %v3734_v20 = vadd.f32 %v3576_v49, %v2001_v15  ;;  %v2113_v22 = vpop.xlane.xlu1 %2112 }
 0x3db   : > { %2246 = vperm.xlu0 %2717, %v2199_v21   ;;  %v2200_v44 = vadd.f32 %v3716_v28, %v2113_v22 }
 0x3dc   : > { %v2086_v17 = vmul.f32 %v3580_v56, %v3734_v20 }
 0x3de   : > { %v2156_v31 = vsel %vm1121_vm11, %v2086_v17, 0.0 }
 0x3df   : > { %v1854_v0 = vpop.f32.mrf.mxu1 }
 0x3e0   : > { %2241 = vperm.xlu1 %2718, %v2198_v38   ;;  %v2004_v57 = vadd.f32 %v2003_v26, %v1854_v0 }
 0x3e2   : > { %v2116_v13 = vpop.xlane.xlu2 %2115  ;;  %v3748_v47 = vadd.f32 %v3576_v49, %v2004_v57 }
 0x3e3   : > { %v2201_v23 = vadd.f32 %v3716_v28, %v2116_v13 }
 0x3e4   : > { %v2087_v52 = vmul.f32 %v3580_v56, %v3748_v47 }
 0x3e6   : > { %v2159_v21 = vsel %vm1121_vm11, %v2087_v52, 0.0 }
 0x3e7   : > { %v1856_v33 = vpop.f32.mrf.mxu1 }
 0x3e8   : > { %v2006_v34 = vadd.f32 %v2005_v4, %v1856_v33 }
 0x3ea   : > { %v2119_v19 = vpop.xlane.xlu0 %2118  ;;  %v3768_v39 = vadd.f32 %v3576_v49, %v2006_v34 }
 0x3eb   : > { %v2202_v3 = vadd.f32 %v3716_v28, %v2119_v19  ;;  %v2010_v19 = vpop.f32.mrf.mxu2 }
 0x3ef   : > { %v1859_v45 = vpop.f32.mrf.mxu1 }
 0x3f0   : > { %v2009_v40 = vadd.f32 %v2008_v55, %v1859_v45 }
 0x3f2   : > { %v2122_v50 = vpop.xlane.xlu1 %2121 }
 0x3f3   : > { %v2013_v57 = vpop.f32.mrf.mxu2 }
 0x3f8   : > { %2151 = vadd.xlane.f32.xlu2 %v2150_v18  ;;  %v3778_v18 = vadd.f32 %v3576_v49, %v2009_v40 }
 0x3fa   : > { %v2125_v6 = vpop.xlane.xlu2 %2124  ;;  %v2089_v27 = vmul.f32 %v3580_v56, %v3778_v18 }
 0x3fb   : > { %v2204_v13 = vadd.f32 %v3716_v28, %v2125_v6 }
 0x3fc   : > { %v2165_v2 = vsel %vm1121_vm11, %v2089_v27, 0.0 }
 0x402   : > { %v2128_v46 = vpop.xlane.xlu0 %2127 }
 0x405   : > { %2154 = vadd.xlane.f32.xlu0 %v2153_v10 }
 0x40a   : > { %2157 = vadd.xlane.f32.xlu1 %v2156_v31  ;;  %v2131_v38 = vpop.xlane.xlu1 %2130  ;;  %v2203_v31 = vadd.f32 %v3716_v28, %v2122_v50 }
 0x410   : > { %2251 = vperm.xlu2 %2719, %v2200_v44   ;;  %v2205_v44 = vadd.f32 %v3716_v28, %v2128_v46 }
 0x412   : > { %v3743_v54 = vpop.xlane.xlu2 %2133 }
 0x419   : > { %2261 = vperm.xlu0 %2717, %v2202_v3  }
 0x41a   : > { %v3764_v62 = vpop.xlane.xlu0 %2136 }
 0x41b   : > { %v2208_v27 = vadd.f32 %v3716_v28, %v3764_v62 }
 0x422   : > { %v3774_v36 = vpop.xlane.xlu1 %2139 }
 0x423   : > { %2256 = vperm.xlu1 %2718, %v2201_v23  }
 0x42a   : > { %v3745_v25 = vpop.xlane.xlu2 %2142 }
 0x432   : > { %v2232_v43 = vpop.permute.xlu2 %2231  ;;  %v3770_v24 = vpop.xlane.xlu0 %2145 }
 0x433   : > { %v2389_v8 = vsel %vm2228_vm3, %v2232_v43, %v3583_v51  ;;  %v2088_v51 = vmul.f32 %v3580_v56, %v3768_v39 }
 0x434   : > { %2421 = vst.msk [vmem:[%s3755_s10] sm:$0xff] %vm1121_vm11, %v2389_v8 }
 0x435   : > { %v2162_v61 = vsel %vm1121_vm11, %v2088_v51, 0.0 }
 0x439   : > { %2160 = vadd.xlane.f32.xlu2 %v2159_v21 }
 0x43a   : > { %v3787_v15 = vpop.xlane.xlu1 %2148 }
 0x443   : > { %2163 = vadd.xlane.f32.xlu0 %v2162_v61 }
 0x445   : > { %v2237_v30 = vpop.permute.xlu0 %2236 }
 0x446   : > { %v2390_v41 = vsel %vm2228_vm3, %v2237_v30, %v3592_v63 }
 0x447   : > { %2422 = vst.msk [vmem:[%s3755_s10 + $0x8] sm:$0xff] %vm1121_vm11, %v2390_v41  ;;  %v2206_v41 = vadd.f32 %v3716_v28, %v2131_v38 }
 0x44d   : > { %v2247_v10 = vpop.permute.xlu0 %2246  ;;  %2166 = vadd.xlane.f32.xlu1 %v2165_v2 }
 0x44e   : > { %v2392_v17 = vsel %vm2228_vm3, %v2247_v10, %v3609_v37  ;;  %v1861_v37 = vpop.f32.mrf.mxu1 }
 0x44f   : > { %2424 = vst.msk [vmem:[%s3755_s10 + $0x18] sm:$0xff] %vm1121_vm11, %v2392_v17  ;;  %v2011_v23 = vadd.f32 %v2010_v19, %v1861_v37 }
 0x451   : > { %2266 = vperm.xlu2 %2719, %v2203_v31   ;;  %v3806_v0 = vadd.f32 %v3576_v49, %v2011_v23  ;;  %v2207_v31 = vadd.f32 %v3716_v28, %v3743_v54 }
 0x452   : > { %v2242_v63 = vpop.permute.xlu1 %2241 }
 0x453   : > { %v2391_v22 = vsel %vm2228_vm3, %v2242_v63, %v3600_v1  ;;  %v2090_v6 = vmul.f32 %v3580_v56, %v3806_v0 }
 0x454   : > { %2423 = vst.msk [vmem:[%s3755_s10 + $0x10] sm:$0xff] %vm1121_vm11, %v2391_v22 }
 0x455   : > { %v2168_v33 = vsel %vm1121_vm11, %v2090_v6, 0.0 }
 0x456   : > { %v1864_v26 = vpop.f32.mrf.mxu1 }
 0x457   : > { %2276 = vperm.xlu0 %2717, %v2205_v44   ;;  %v2014_v50 = vadd.f32 %v2013_v57, %v1864_v26 }
 0x459   : > { %v3816_v43 = vadd.f32 %v3576_v49, %v2014_v50 }
 0x45b   : > { %v2091_v8 = vmul.f32 %v3580_v56, %v3816_v43 }
 0x45d   : > { %v2171_v4 = vsel %vm1121_vm11, %v2091_v8, 0.0 }
 0x45e   : > { %v1866_v52 = vpop.f32.mrf.mxu1 }
 0x466   : > { %2271 = vperm.xlu1 %2718, %v2204_v13   ;;  %v1869_v10 = vpop.f32.mrf.mxu1 }
 0x46b   : > { %v3803_v3 = vpop.xlane.xlu2 %2151 }
 0x46e   : > { %v1871_v22 = vpop.f32.mrf.mxu1 }
 0x473   : > { %v2252_v1 = vpop.permute.xlu2 %2251 }
 0x474   : > { %v2393_v46 = vsel %vm2228_vm3, %v2252_v1, %v3617_v32  ;;  %v2015_v32 = vpop.f32.mrf.mxu2 }
 0x475   : > { %2425 = vst.msk [vmem:[%s3755_s10 + $0x20] sm:$0xff] %vm1121_vm11, %v2393_v46  ;;  %v2016_v34 = vadd.f32 %v2015_v32, %v1866_v52  ;;  %v2209_v32 = vadd.f32 %v3716_v28, %v3774_v36  ;;  %v2210_v36 = vadd.f32 %v3716_v28, %v3745_v25 }
 0x477   : > { %v3825_v45 = vadd.f32 %v3576_v49, %v2016_v34  ;;  %v2211_v34 = vadd.f32 %v3716_v28, %v3770_v24 }
 0x478   : > { %v3822_v21 = vpop.xlane.xlu0 %2154 }
 0x479   : > { %v2092_v55 = vmul.f32 %v3580_v56, %v3825_v45 }
 0x47a   : > { %2169 = vadd.xlane.f32.xlu2 %v2168_v33 }
 0x47b   : > { %v2174_v30 = vsel %vm1121_vm11, %v2092_v55, 0.0 }
 0x47c   : > { %v2018_v17 = vpop.f32.mrf.mxu2 }
 0x47d   : > { %v3832_v61 = vpop.xlane.xlu1 %2157  ;;  %v2019_v63 = vadd.f32 %v2018_v17, %v1869_v10 }
 0x47f   : > { %v3850_v44 = vadd.f32 %v3576_v49, %v2019_v63 }
 0x481   : > { %2172 = vadd.xlane.f32.xlu0 %v2171_v4  ;;  %v2093_v54 = vmul.f32 %v3580_v56, %v3850_v44 }
 0x483   : > { %v2177_v23 = vsel %vm1121_vm11, %v2093_v54, 0.0 }
 0x484   : > { %v2020_v62 = vpop.f32.mrf.mxu2 }
 0x485   : > { %v2021_v13 = vadd.f32 %v2020_v62, %v1871_v22 }
 0x487   : > { %v3856_v19 = vadd.f32 %v3576_v49, %v2021_v13 }
 0x489   : > { %v2094_v26 = vmul.f32 %v3580_v56, %v3856_v19 }
 0x48b   : > { %v2262_v51 = vpop.permute.xlu0 %2261  ;;  %v2180_v57 = vsel %vm1121_vm11, %v2094_v26, 0.0 }
 0x48c   : > { %v2395_v40 = vsel %vm2228_vm3, %v2262_v51, %v3634_v48  ;;  %v2023_v50 = vpop.f32.mrf.mxu2 }
 0x48d   : > { %2427 = vst.msk [vmem:[%s3755_s10 + $0x30] sm:$0xff] %vm1121_vm11, %v2395_v40 }
 0x490   : > { %2175 = vadd.xlane.f32.xlu1 %v2174_v30 }
 0x492   : > { %2281 = vperm.xlu2 %2719, %v2206_v41  }
 0x494   : > { %v2025_v30 = vpop.f32.mrf.mxu2 }
 0x495   : > { %v2257_v2 = vpop.permute.xlu1 %2256  ;;  %2291 = vperm.xlu0 %2717, %v2208_v27  }
 0x496   : > { %v2394_v48 = vsel %vm2228_vm3, %v2257_v2, %v3626_v35 }
 0x497   : > { %2426 = vst.msk [vmem:[%s3755_s10 + $0x28] sm:$0xff] %vm1121_vm11, %v2394_v48 }
 0x49c   : > { %v2028_v27 = vpop.f32.mrf.mxu2 }
 0x4a4   : > { %v2030_v54 = vpop.f32.mrf.mxu2 }
 0x4a9   : > { %2286 = vperm.xlu1 %2718, %v2207_v31  }
 0x4ac   : > { %v3847_v38 = vpop.xlane.xlu2 %2160 }
 0x4b4   : > { %v2267_v37 = vpop.permute.xlu2 %2266 }
 0x4b5   : > { %v2396_v35 = vsel %vm2228_vm3, %v2267_v37, %v3643_v29  ;;  %v1874_v29 = vpop.f32.mrf.mxu1 }
 0x4b6   : > { %2428 = vst.msk [vmem:[%s3755_s10 + $0x38] sm:$0xff] %vm1121_vm11, %v2396_v35  ;;  %v2164_v1 = vpop.xlane.xlu0 %2163  ;;  %v2024_v46 = vadd.f32 %v2023_v50, %v1874_v29  ;;  %v2212_v29 = vadd.f32 %v3716_v28, %v3787_v15 }
 0x4b8   : > { %v3870_v8 = vadd.f32 %v3576_v49, %v2024_v46 }
 0x4ba   : > { %v2095_v52 = vmul.f32 %v3580_v56, %v3870_v8 }
 0x4bb   : > { %2178 = vadd.xlane.f32.xlu2 %v2177_v23 }
 0x4bc   : > { %v2183_v51 = vsel %vm1121_vm11, %v2095_v52, 0.0 }
 0x4bd   : > { %v1876_v40 = vpop.f32.mrf.mxu1 }
 0x4be   : > { %v2026_v2 = vadd.f32 %v2025_v30, %v1876_v40 }
 0x4bf   : > { %2181 = vadd.xlane.f32.xlu0 %v2180_v57  ;;  %v2214_v57 = vadd.f32 %v3716_v28, %v3822_v21 }
 0x4c0   : > { %v2167_v4 = vpop.xlane.xlu1 %2166  ;;  %v3889_v10 = vadd.f32 %v3576_v49, %v2026_v2 }
 0x4c1   : > { %v2218_v15 = vadd.f32 %v3716_v28, %v2167_v4 }
 0x4c2   : > { %v2096_v25 = vmul.f32 %v3580_v56, %v3889_v10 }
 0x4c4   : > { %v2186_v22 = vsel %vm1121_vm11, %v2096_v25, 0.0 }
 0x4c5   : > { %v1879_v41 = vpop.f32.mrf.mxu1 }
 0x4c6   : > { %v2029_v48 = vadd.f32 %v2028_v27, %v1879_v41 }
 0x4c8   : > { %v3892_v17 = vadd.f32 %v3576_v49, %v2029_v48 }
 0x4c9   : > { %v2277_v6 = vpop.permute.xlu0 %2276 }
 0x4ca   : > { %v2398_v33 = vsel %vm2228_vm3, %v2277_v6, %v3658_v11  ;;  %v2097_v63 = vmul.f32 %v3580_v56, %v3892_v17  ;;  %v2217_v6 = vadd.f32 %v3716_v28, %v2164_v1 }
 0x4cb   : > { %2430 = vst.msk [vmem:[%s3755_s10 + $0x48] sm:$0xff] %vm1121_vm11, %v2398_v33 }
 0x4cc   : > { %v2189_v62 = vsel %vm1121_vm11, %v2097_v63, 0.0 }
 0x4cd   : > { %v1881_v37 = vpop.f32.mrf.mxu1 }
 0x4ce   : > { %v2031_v23 = vadd.f32 %v2030_v54, %v1881_v37 }
 0x4d0   : > { %v3911_v26 = vadd.f32 %v3576_v49, %v2031_v23  ;;  %v2215_v49 = vadd.f32 %v3716_v28, %v3832_v61  ;;  %v2213_v61 = vadd.f32 %v3716_v28, %v3803_v3 }
 0x4d2   : > { %v2098_v50 = vmul.f32 %v3580_v56, %v3911_v26 }
 0x4d3   : > { %2306 = vperm.xlu0 %2717, %v2211_v34   ;;  %2296 = vperm.xlu2 %2719, %v2209_v32   ;;  %v2216_v34 = vadd.f32 %v3716_v28, %v3847_v38 }
 0x4d4   : > { %2184 = vadd.xlane.f32.xlu1 %v2183_v51 }
 0x4d8   : > { %v2272_v11 = vpop.permute.xlu1 %2271 }
 0x4d9   : > { %v2397_v55 = vsel %vm2228_vm3, %v2272_v11, %v3650_v5 }
 0x4da   : > { %2429 = vst.msk [vmem:[%s3755_s10 + $0x40] sm:$0xff] %vm1121_vm11, %v2397_v55 }
 0x4ed   : > { %2301 = vperm.xlu1 %2718, %v2210_v36   ;;  %v2170_v24 = vpop.xlane.xlu2 %2169 }
 0x4ee   : > { %v2219_v3 = vadd.f32 %v3716_v28, %v2170_v24 }
 0x4f4   : > { %v2173_v13 = vpop.xlane.xlu0 %2172 }
 0x4f5   : > { %v2282_v5 = vpop.permute.xlu2 %2281  ;;  %v2220_v56 = vadd.f32 %v3716_v28, %v2173_v13 }
 0x4f6   : > { %v2399_v31 = vsel %vm2228_vm3, %v2282_v5, %v3665_v9 }
 0x4f7   : > { %2431 = vst.msk [vmem:[%s3755_s10 + $0x50] sm:$0xff] %vm1121_vm11, %v2399_v31 }
 0x4fc   : > { %2187 = vadd.xlane.f32.xlu2 %v2186_v22 }
 0x4fd   : > { %2190 = vadd.xlane.f32.xlu0 %v2189_v62 }
 0x503   : > { %v2176_v46 = vpop.xlane.xlu1 %2175 }
 0x504   : > { %v2221_v1 = vadd.f32 %v3716_v28, %v2176_v46 }
 0x507   : > { %v2292_v35 = vpop.permute.xlu0 %2291 }
 0x508   : > { %v2401_v9 = vsel %vm2228_vm3, %v2292_v35, %v3680_v7  ;;  %v2192_v7 = vsel %vm1121_vm11, %v2098_v50, 0.0 }
 0x509   : > { %2433 = vst.msk [vmem:[%s3755_s10 + $0x60] sm:$0xff] %vm1121_vm11, %v2401_v9 }
 0x511   : > { %2321 = vperm.xlu0 %2717, %v2214_v57  }
 0x514   : > { %2311 = vperm.xlu2 %2719, %v2212_v29  }
 0x517   : > { %2193 = vadd.xlane.f32.xlu1 %v2192_v7 }
 0x519   : > { %2336 = vperm.xlu0 %2717, %v2217_v6  }
 0x51b   : > { %v2287_v33 = vpop.permute.xlu1 %2286 }
 0x51c   : > { %v2400_v21 = vsel %vm2228_vm3, %v2287_v33, %v3673_v53  ;;  %2326 = vperm.xlu2 %2719, %v2215_v49  }
 0x51d   : > { %2432 = vst.msk [vmem:[%s3755_s10 + $0x58] sm:$0xff] %vm1121_vm11, %v2400_v21 }
 0x521   : > { %2351 = vperm.xlu0 %2717, %v2220_v56  }
 0x524   : > { %2341 = vperm.xlu2 %2719, %v2218_v15  }
 0x52c   : > { %2356 = vperm.xlu2 %2719, %v2221_v1  }
 0x52e   : > { %v2179_v52 = vpop.xlane.xlu2 %2178 }
 0x52f   : > { %v2222_v55 = vadd.f32 %v3716_v28, %v2179_v52 }
 0x530   : > { %2316 = vperm.xlu1 %2718, %v2213_v61  }
 0x532   : > { %v2182_v53 = vpop.xlane.xlu0 %2181 }
 0x533   : > { %v2223_v32 = vadd.f32 %v3716_v28, %v2182_v53 }
 0x535   : > { %2366 = vperm.xlu0 %2717, %v2223_v32  }
 0x536   : > { %v2297_v51 = vpop.permute.xlu2 %2296 }
 0x537   : > { %v2402_v4 = vsel %vm2228_vm3, %v2297_v51, %v3688_v59 }
 0x538   : > { %2434 = vst.msk [vmem:[%s3755_s10 + $0x68] sm:$0xff] %vm1121_vm11, %v2402_v4  ;;  %2331 = vperm.xlu1 %2718, %v2216_v34  }
 0x540   : > { %2346 = vperm.xlu1 %2718, %v2219_v3  }
 0x545   : > { %v2307_v11 = vpop.permute.xlu0 %2306 }
 0x546   : > { %v2404_v40 = vsel %vm2228_vm3, %v2307_v11, %v3702_v14 }
 0x547   : > { %2436 = vst.msk [vmem:[%s3755_s10 + $0x78] sm:$0xff] %vm1121_vm11, %v2404_v40  ;;  %v2185_v38 = vpop.xlane.xlu1 %2184 }
 0x548   : > { %v2224_v30 = vadd.f32 %v3716_v28, %v2185_v38  ;;  %2361 = vperm.xlu1 %2718, %v2222_v55  }
 0x54a   : > { %2371 = vperm.xlu2 %2719, %v2224_v30  }
 0x55f   : > { %v2302_v59 = vpop.permute.xlu1 %2301 }
 0x560   : > { %v2403_v36 = vsel %vm2228_vm3, %v2302_v59, %v3695_v60 }
 0x561   : > { %2435 = vst.msk [vmem:[%s3755_s10 + $0x70] sm:$0xff] %vm1121_vm11, %v2403_v36 }
 0x56f   : > { %v2188_v41 = vpop.xlane.xlu2 %2187 }
 0x570   : > { %v2225_v14 = vadd.f32 %v3716_v28, %v2188_v41  ;;  %v2191_v24 = vpop.xlane.xlu0 %2190 }
 0x571   : > { %v2226_v27 = vadd.f32 %v3716_v28, %v2191_v24 }
 0x572   : > { %2376 = vperm.xlu1 %2718, %v2225_v14  }
 0x573   : > { %2381 = vperm.xlu0 %2717, %v2226_v27  }
 0x577   : > { %v2312_v2 = vpop.permute.xlu2 %2311 }
 0x578   : > { %v2405_v48 = vsel %vm2228_vm3, %v2312_v2, %v3708_v12 }
 0x579   : > { %2437 = vst.msk [vmem:[%s3755_s10 + $0x80] sm:$0xff] %vm1121_vm11, %v2405_v48 }
 0x57f   : > { %v2327_v60 = vpop.permute.xlu2 %2326 }
 0x580   : > { %v2408_v5 = vsel %vm2228_vm3, %v2327_v60, %v3734_v20 }
 0x581   : > { %2440 = vst.msk [vmem:[%s3755_s10 + $0x98] sm:$0xff] %vm1121_vm11, %v2408_v5 }
 0x583   : > { %v2322_v31 = vpop.permute.xlu0 %2321 }
 0x584   : > { %v2407_v25 = vsel %vm2228_vm3, %v2322_v31, %v3729_v58 }
 0x585   : > { %2439 = vst.msk [vmem:[%s3755_s10 + $0x90] sm:$0xff] %vm1121_vm11, %v2407_v25 }
 0x587   : > { %v2342_v63 = vpop.permute.xlu2 %2341 }
 0x588   : > { %v2411_v12 = vsel %vm2228_vm3, %v2342_v63, %v3778_v18 }
 0x589   : > { %2443 = vst.msk [vmem:[%s3755_s10 + $0xb0] sm:$0xff] %vm1121_vm11, %v2411_v12 }
 0x58a   : > { %v2194_v20 = vpop.xlane.xlu1 %2193 }
 0x58b   : > { %v2227_v22 = vadd.f32 %v3716_v28, %v2194_v20  ;;  %v2337_v62 = vpop.permute.xlu0 %2336 }
 0x58c   : > { %v2410_v58 = vsel %vm2228_vm3, %v2337_v62, %v3768_v39 }
 0x58d   : > { %2442 = vst.msk [vmem:[%s3755_s10 + $0xa8] sm:$0xff] %vm1121_vm11, %v2410_v58  ;;  %2386 = vperm.xlu2 %2719, %v2227_v22  }
 0x58f   : > { %v2357_v13 = vpop.permute.xlu2 %2356 }
 0x590   : > { %v2414_v18 = vsel %vm2228_vm3, %v2357_v13, %v3825_v45 }
 0x591   : > { %2446 = vst.msk [vmem:[%s3755_s10 + $0xc8] sm:$0xff] %vm1121_vm11, %v2414_v18 }
 0x593   : > { %v2352_v37 = vpop.permute.xlu0 %2351 }
 0x594   : > { %v2413_v28 = vsel %vm2228_vm3, %v2352_v37, %v3816_v43 }
 0x595   : > { %2445 = vst.msk [vmem:[%s3755_s10 + $0xc0] sm:$0xff] %vm1121_vm11, %v2413_v28 }
 0x5a2   : > { %v2317_v39 = vpop.permute.xlu1 %2316 }
 0x5a3   : > { %v2406_v35 = vsel %vm2228_vm3, %v2317_v39, %v3723_v42 }
 0x5a4   : > { %2438 = vst.msk [vmem:[%s3755_s10 + $0x88] sm:$0xff] %vm1121_vm11, %v2406_v35  ;;  %v2372_v45 = vpop.permute.xlu2 %2371 }
 0x5a5   : > { %v2417_v9 = vsel %vm2228_vm3, %v2372_v45, %v3870_v8 }
 0x5a6   : > { %2449 = vst.msk [vmem:[%s3755_s10 + $0xe0] sm:$0xff] %vm1121_vm11, %v2417_v9 }
 0x5a7   : > { %v2367_v43 = vpop.permute.xlu0 %2366 }
 0x5a8   : > { %v2416_v54 = vsel %vm2228_vm3, %v2367_v43, %v3856_v19 }
 0x5a9   : > { %2448 = vst.msk [vmem:[%s3755_s10 + $0xd8] sm:$0xff] %vm1121_vm11, %v2416_v54 }
 0x5aa   : > { %v2332_v42 = vpop.permute.xlu1 %2331 }
 0x5ab   : > { %v2409_v23 = vsel %vm2228_vm3, %v2332_v42, %v3748_v47 }
 0x5ac   : > { %2441 = vst.msk [vmem:[%s3755_s10 + $0xa0] sm:$0xff] %vm1121_vm11, %v2409_v23 }
 0x5b2   : > { %v2347_v8 = vpop.permute.xlu1 %2346 }
 0x5b3   : > { %v2412_v57 = vsel %vm2228_vm3, %v2347_v8, %v3806_v0 }
 0x5b4   : > { %2444 = vst.msk [vmem:[%s3755_s10 + $0xb8] sm:$0xff] %vm1121_vm11, %v2412_v57 }
 0x5ba   : > { %v2362_v29 = vpop.permute.xlu1 %2361 }
 0x5bb   : > { %v2415_v19 = vsel %vm2228_vm3, %v2362_v29, %v3850_v44 }
 0x5bc   : > { %2447 = vst.msk [vmem:[%s3755_s10 + $0xd0] sm:$0xff] %vm1121_vm11, %v2415_v19 }
 0x5e4   : > { %v2377_v50 = vpop.permute.xlu1 %2376 }
 0x5e5   : > { %v2418_v47 = vsel %vm2228_vm3, %v2377_v50, %v3889_v10  ;;  %v2382_v46 = vpop.permute.xlu0 %2381 }
 0x5e6   : > { %2450 = vst.msk [vmem:[%s3755_s10 + $0xe8] sm:$0xff] %vm1121_vm11, %v2418_v47  ;;  %v2419_v0 = vsel %vm2228_vm3, %v2382_v46, %v3892_v17 }
 0x5e7   : > { %2451 = vst.msk [vmem:[%s3755_s10 + $0xf0] sm:$0xff] %vm1121_vm11, %v2419_v0  ;;  %v2387_v7 = vpop.permute.xlu2 %2386 }
 0x5e8   : > { %v2420_v44 = vsel %vm2228_vm3, %v2387_v7, %v3911_v26 }
 0x5e9   : > { %2452 = vst.msk [vmem:[%s3755_s10 + $0xf8] sm:$0xff] %vm1121_vm11, %v2420_v44 }
 0x5ea PF: > { %s15_s18 = sadd.s32 1, %s2727_s18  }
 0x5eb   : > { %p12_p4 = scmp.ge.s32.totalorder %s15_s18, 4  }
 0x5ed   :  { %14 = sbr.rel (!%p12_p4) target bundleno = 1 (0x1), region = 73 }

</bundles_post_ra>
